<compile_context>
chip_gen: v5e
topology: v5e:2x2
jax: 0.10.0
libtpu: 0.0.40
codegen_flags: <defaults>
</compile_context>

<pallas_src>
import functools
import math

import numpy as np
import jax
import jax.numpy as jnp
from jax.experimental import pallas as pl
from jax.experimental.pallas import tpu as pltpu


# ----------------------------- position table -----------------------------
def position_encoding(n_position, d_hid, padding_idx=None):
    def cal_angle(position, hid_idx):
        return position / np.power(10000, 2 * (hid_idx // 2) / d_hid)

    table = np.array(
        [[cal_angle(pos, j) for j in range(d_hid)] for pos in range(n_position)]
    )
    table[:, 0::2] = np.sin(table[:, 0::2])
    table[:, 1::2] = np.cos(table[:, 1::2])
    if padding_idx is not None:
        table[padding_idx] = 0.0
    return jnp.asarray(table, dtype=jnp.float32)


# ------------------------------- Pallas kernel -------------------------------
def _layer_norm_padded(x, gamma, beta, d_true, eps=1e-5):
    """LayerNorm over the TRUE feature width; padded lanes of x are zero and
    gamma/beta are zero-padded, so padded output lanes stay exactly zero."""
    inv_d = 1.0 / float(d_true)
    s1 = jnp.sum(x, axis=-1, keepdims=True)
    s2 = jnp.sum(x * x, axis=-1, keepdims=True)
    mu = s1 * inv_d
    var = s2 * inv_d - mu * mu
    return (x - mu) * jax.lax.rsqrt(var + eps) * gamma + beta


def encoder_kernel(x_ref, qbid_ref, kbid_ref, npad_ref,
                   wqkv_ref, bqkv_ref, wo_ref, w1_ref, b1_ref, w2_ref,
                   vecs_ref, out_ref,
                   *, n_layers, n_head, d_k, d_v, d_model):
    f32 = jnp.float32
    bf16 = jnp.bfloat16
    hdk = n_head * d_k

    # ---- masks: computed once from O(BL) vectors (no (BL,BL) HBM input) ----
    npad = npad_ref[...]                                       # (BL, 1) f32
    # allowed(i,j) <=> query i and key j in same batch AND key j is non-pad
    bias = jnp.where(qbid_ref[...] == kbid_ref[...], 0.0, -1e30).astype(f32)
    bias = bias[None]                                          # (1, BL, BL), hoisted

    x = x_ref[...]                                             # (BL, Dp) f32 resident activation

    for l in range(n_layers):                                  # resident weights, static unroll
        xb = x.astype(bf16)

        # ---- fused QKV projection: ONE wide bf16 MXU matmul (K = Dp) ----
        qkv = jnp.dot(xb, wqkv_ref[l], preferred_element_type=f32) + bqkv_ref[l]

        # re-pack head-major (H, BL, d_k/d_v) once per layer
        q = jnp.stack([qkv[:, h * d_k:(h + 1) * d_k]
                       for h in range(n_head)], axis=0).astype(bf16)
        k = jnp.stack([qkv[:, hdk + h * d_k: hdk + (h + 1) * d_k]
                       for h in range(n_head)], axis=0).astype(bf16)
        v = jnp.stack([qkv[:, 2 * hdk + h * d_v: 2 * hdk + (h + 1) * d_v]
                       for h in range(n_head)], axis=0).astype(bf16)

        # ---- head-batched attention (bf16 MXU operands, f32 accumulation) ----
        s = jax.lax.dot_general(q, k, (((2,), (2,)), ((0,), (0,))),
                                preferred_element_type=f32) + bias   # (H, BL, BL)
        m = jnp.max(s, axis=-1, keepdims=True)
        e = jnp.exp(s - m)
        p = e * pl.reciprocal(jnp.sum(e, axis=-1, keepdims=True), approx=True)

        ctx = jax.lax.dot_general(p.astype(bf16), v,
                                  (((2,), (1,)), ((0,), (0,))),
                                  preferred_element_type=f32)        # (H, BL, d_v)

        # ---- output projection: head-batched dot, summed over heads ----
        proj = jax.lax.dot_general(ctx.astype(bf16), wo_ref[l],
                                   (((2,), (1,)), ((0,), (0,))),
                                   preferred_element_type=f32)       # (H, BL, Dp)
        vecs = vecs_ref[l]                                           # (6, Dp): bo,g1,be1,b2,g2,be2
        attn = jnp.sum(proj, axis=0) + vecs[0:1]
        # TODO(synk): dropout (p=0.1) is identity in inference mode.
        attn = _layer_norm_padded(attn + x, vecs[1:2], vecs[2:3], d_model)
        attn = attn * npad

        # ---- position-wise feed-forward (Conv1d k=1 == matmul) ----
        h1 = jnp.dot(attn.astype(bf16), w1_ref[l],
                     preferred_element_type=f32) + b1_ref[l]
        h1 = jnp.maximum(h1, 0.0)
        ffn = jnp.dot(h1.astype(bf16), w2_ref[l],
                      preferred_element_type=f32) + vecs[3:4]
        y = _layer_norm_padded(ffn + attn, vecs[4:5], vecs[5:6], d_model)
        x = y * npad

    out_ref[...] = x


# ---------------------------- parameter stacking -----------------------------
def _pad_to(a, rows, cols):
    r, c = a.shape
    return jnp.pad(a, ((0, rows - r), (0, cols - c)))


def stack_layer_params(layer_params, *, n_head, d_k, d_v, d_pad, hid_pad):
    """Stack per-layer params, fold 1/sqrt(d_k) into wq/bq, fuse QKV weights,
    pack small vectors, zero-pad feature dims to 128 lanes, cast matmul
    weights to bf16 (f32 accumulation kept in-kernel)."""
    scale = 1.0 / math.sqrt(d_k)
    wqkv, bqkv, wo, w1, b1, w2, vecs = [], [], [], [], [], [], []
    for p in layer_params:
        wqkv_l = jnp.concatenate([p['wq'] * scale, p['wk'], p['wv']], axis=1)
        wqkv.append(_pad_to(wqkv_l, d_pad, wqkv_l.shape[1]).astype(jnp.bfloat16))
        bqkv.append(jnp.concatenate([p['bq'] * scale, p['bk'], p['bv']], axis=1))
        wo_l = _pad_to(p['wo'], n_head * d_v, d_pad)            # (H*dv, Dp)
        wo.append(wo_l.reshape(n_head, d_v, d_pad).astype(jnp.bfloat16))
        w1.append(_pad_to(p['w1'], d_pad, hid_pad).astype(jnp.bfloat16))
        b1.append(_pad_to(p['b1'], 1, hid_pad))
        w2.append(_pad_to(p['w2'], hid_pad, d_pad).astype(jnp.bfloat16))
        vec = jnp.concatenate([p['bo'], p['g1'], p['be1'],
                               p['b2'], p['g2'], p['be2']], axis=0)  # (6, D)
        vecs.append(_pad_to(vec, 6, d_pad))      # zero-padded lanes (incl. gamma)
    return [jnp.stack(a, axis=0) for a in (wqkv, bqkv, wo, w1, b1, w2, vecs)]


# --------------------------------- forward -----------------------------------
def encoder_forward(src_seq, src_pos, word_emb, pos_table, layer_params,
                    *, n_head, d_k, d_v, d_inner):
    B, L = src_seq.shape
    d_model = word_emb.shape[1]
    BL = B * L
    n_layers = len(layer_params)
    d_pad = max(128, ((d_model + 127) // 128) * 128)
    hid_pad = max(128, ((d_inner + 127) // 128) * 128)

    # embeddings (gathers stay in plain-JAX glue), zero-padded to lane-dense Dp
    x = (word_emb[src_seq] + pos_table[src_pos]).astype(jnp.float32)
    x = x.reshape(BL, d_model)
    x = jnp.pad(x, ((0, 0), (0, d_pad - d_model)))

    # O(BL) mask vectors; the (BL,BL) additive bias is built in-kernel.
    seq_flat = src_seq.reshape(BL)
    batch_id = jnp.repeat(jnp.arange(B, dtype=jnp.int32), L).astype(jnp.float32)
    qbid = batch_id.reshape(BL, 1)
    kbid = jnp.where(seq_flat != 0, batch_id, -1.0).reshape(1, BL)
    npad = (seq_flat != 0).astype(jnp.float32).reshape(BL, 1)

    weights = stack_layer_params(layer_params, n_head=n_head, d_k=d_k, d_v=d_v,
                                 d_pad=d_pad, hid_pad=hid_pad)
    inputs = [x, qbid, kbid, npad, *weights]

    def full_spec(arr):
        nd = arr.ndim
        return pl.BlockSpec(arr.shape, lambda i, _nd=nd: (0,) * _nd)

    in_specs = [full_spec(a) for a in inputs]

    # explicit VMEM budget (matters on v7x: 32 MiB scoped default of 64 MiB)
    in_bytes = sum(int(a.size) * a.dtype.itemsize for a in inputs)
    out_bytes = BL * d_pad * 4
    interm = 4 * (n_head * BL * BL * 4            # scores / probs
                  + BL * (3 * n_head * d_k) * 4   # fused qkv
                  + BL * hid_pad * 4 + BL * d_pad * 4)
    vmem_limit = int(min(max(4 * (in_bytes + out_bytes + interm), 32 << 20),
                         100 << 20))

    out_flat = pl.pallas_call(
        functools.partial(encoder_kernel, n_layers=n_layers, n_head=n_head,
                          d_k=d_k, d_v=d_v, d_model=d_model),
        out_shape=jax.ShapeDtypeStruct((BL, d_pad), jnp.float32),
        grid=(1,),
        in_specs=in_specs,
        out_specs=pl.BlockSpec((BL, d_pad), lambda i: (0, 0)),
        compiler_params=pltpu.CompilerParams(
            dimension_semantics=("arbitrary",),
            vmem_limit_bytes=vmem_limit),
    )(*inputs)
    return out_flat[:, :d_model].reshape(B, L, d_model)


# ------------------------------- parameter init ------------------------------
def init_layer_params(key, d_model, d_inner, n_head, d_k, d_v):
    ks = jax.random.split(key, 6)
    s = 0.02
    return dict(
        wq=jax.random.normal(ks[0], (d_model, n_head * d_k), jnp.float32) * s,
        bq=jnp.zeros((1, n_head * d_k), jnp.float32),
        wk=jax.random.normal(ks[1], (d_model, n_head * d_k), jnp.float32) * s,
        bk=jnp.zeros((1, n_head * d_k), jnp.float32),
        wv=jax.random.normal(ks[2], (d_model, n_head * d_v), jnp.float32) * s,
        bv=jnp.zeros((1, n_head * d_v), jnp.float32),
        wo=jax.random.normal(ks[3], (n_head * d_v, d_model), jnp.float32) * s,
        bo=jnp.zeros((1, d_model), jnp.float32),
        g1=jnp.ones((1, d_model), jnp.float32),
        be1=jnp.zeros((1, d_model), jnp.float32),
        w1=jax.random.normal(ks[4], (d_model, d_inner), jnp.float32) * s,
        b1=jnp.zeros((1, d_inner), jnp.float32),
        w2=jax.random.normal(ks[5], (d_inner, d_model), jnp.float32) * s,
        b2=jnp.zeros((1, d_model), jnp.float32),
        g2=jnp.ones((1, d_model), jnp.float32),
        be2=jnp.zeros((1, d_model), jnp.float32),
    )


# ----------------------------------- main -------------------------------------
if __name__ == "__main__":
    # small hyper-parameters consistent with the module
    d_model = 32          # == embedding_dim (required by the forward pass)
    embedding_dim = 32
    n_position = 20
    n_symbols = 30
    n_head = 2
    d_hidden = 64
    d_k = d_v = 16
    n_layers = 2
    B, L = 2, 8

    key = jax.random.PRNGKey(0)
    k_emb, k_seq, *k_layers = jax.random.split(key, 2 + n_layers)

    # nn.Embedding(padding_idx=0): row 0 zeroed
    word_emb = jax.random.normal(k_emb, (n_symbols, embedding_dim),
                                 jnp.float32) * 0.02
    word_emb = word_emb.at[0].set(0.0)
    pos_table = position_encoding(n_position, embedding_dim, padding_idx=0)

    layer_params = [
        init_layer_params(k_layers[i], d_model, d_hidden, n_head, d_k, d_v)
        for i in range(n_layers)
    ]

    # deterministic inputs with trailing padding (token id 0)
    src_seq = jax.random.randint(k_seq, (B, L), 1, n_symbols, dtype=jnp.int32)
    lengths = jnp.array([[6], [5]], dtype=jnp.int32)
    pad_tail = jnp.arange(L, dtype=jnp.int32)[None, :] >= lengths
    src_seq = jnp.where(pad_tail, 0, src_seq)
    src_pos = jnp.where(src_seq != 0,
                        jnp.arange(1, L + 1, dtype=jnp.int32)[None, :], 0)

    out = encoder_forward(src_seq, src_pos, word_emb, pos_table, layer_params,
                          n_head=n_head, d_k=d_k, d_v=d_v, d_inner=d_hidden)
    out = jax.block_until_ready(out)

    assert out.shape == (B, L, d_model)
    assert bool(jnp.all(jnp.isfinite(out)))
    # non-pad masking: padded positions must be exactly zero
    pad_rows = (src_seq == 0)[..., None]
    assert bool(jnp.all(jnp.where(pad_rows, out, 0.0) == 0.0))
    print("KERNEL_OK")
</pallas_src>

<mosaic_0001>
module attributes {stable_mosaic.version = 11 : i64} {
  func.func @encoder_kernel(%arg0: i32, %arg1: memref<16x128xf32, #tpu.memory_space<vmem>>, %arg2: memref<16x1xf32, #tpu.memory_space<vmem>>, %arg3: memref<1x16xf32, #tpu.memory_space<vmem>>, %arg4: memref<16x1xf32, #tpu.memory_space<vmem>>, %arg5: memref<2x128x96xbf16, #tpu.memory_space<vmem>>, %arg6: memref<2x1x96xf32, #tpu.memory_space<vmem>>, %arg7: memref<2x2x16x128xbf16, #tpu.memory_space<vmem>>, %arg8: memref<2x128x128xbf16, #tpu.memory_space<vmem>>, %arg9: memref<2x1x128xf32, #tpu.memory_space<vmem>>, %arg10: memref<2x128x128xbf16, #tpu.memory_space<vmem>>, %arg11: memref<2x6x128xf32, #tpu.memory_space<vmem>>, %arg12: memref<16x128xf32, #tpu.memory_space<vmem>>) attributes {dimension_semantics = [#tpu.dimension_semantics<arbitrary>], iteration_bounds = array<i64: 1>, scalar_prefetch = 0 : i64, scratch_operands = 0 : i64, tpu.core_type = #tpu.core_type<tc>, window_params = [{pipeline_mode = #tpu.pipeline_mode<synchronous>, transform_indices = @transform_0, window_bounds = array<i64: 16, 128>}, {pipeline_mode = #tpu.pipeline_mode<synchronous>, transform_indices = @transform_1, window_bounds = array<i64: 16, 1>}, {pipeline_mode = #tpu.pipeline_mode<synchronous>, transform_indices = @transform_2, window_bounds = array<i64: 1, 16>}, {pipeline_mode = #tpu.pipeline_mode<synchronous>, transform_indices = @transform_3, window_bounds = array<i64: 16, 1>}, {pipeline_mode = #tpu.pipeline_mode<synchronous>, transform_indices = @transform_4, window_bounds = array<i64: 2, 128, 96>}, {pipeline_mode = #tpu.pipeline_mode<synchronous>, transform_indices = @transform_5, window_bounds = array<i64: 2, 1, 96>}, {pipeline_mode = #tpu.pipeline_mode<synchronous>, transform_indices = @transform_6, window_bounds = array<i64: 2, 2, 16, 128>}, {pipeline_mode = #tpu.pipeline_mode<synchronous>, transform_indices = @transform_7, window_bounds = array<i64: 2, 128, 128>}, {pipeline_mode = #tpu.pipeline_mode<synchronous>, transform_indices = @transform_8, window_bounds = array<i64: 2, 1, 128>}, {pipeline_mode = #tpu.pipeline_mode<synchronous>, transform_indices = @transform_9, window_bounds = array<i64: 2, 128, 128>}, {pipeline_mode = #tpu.pipeline_mode<synchronous>, transform_indices = @transform_10, window_bounds = array<i64: 2, 6, 128>}, {pipeline_mode = #tpu.pipeline_mode<synchronous>, transform_indices = @transform_11, window_bounds = array<i64: 16, 128>}]} {
    %c0 = arith.constant 0 : index
    %c0_0 = arith.constant 0 : index
    %0 = vector.load %arg4[%c0, %c0_0] : memref<16x1xf32, #tpu.memory_space<vmem>>, vector<16x1xf32>
    %c0_1 = arith.constant 0 : index
    %c0_2 = arith.constant 0 : index
    %1 = vector.load %arg2[%c0_1, %c0_2] : memref<16x1xf32, #tpu.memory_space<vmem>>, vector<16x1xf32>
    %c0_3 = arith.constant 0 : index
    %c0_4 = arith.constant 0 : index
    %2 = vector.load %arg3[%c0_3, %c0_4] : memref<1x16xf32, #tpu.memory_space<vmem>>, vector<1x16xf32>
    %3 = vector.broadcast %1 : vector<16x1xf32> to vector<16x16xf32>
    %4 = vector.broadcast %2 : vector<1x16xf32> to vector<16x16xf32>
    %5 = arith.cmpf oeq, %3, %4 : vector<16x16xf32>
    %cst = arith.constant 0.000000e+00 : f32
    %cst_5 = arith.constant -1.000000e+30 : f32
    %6 = vector.broadcast %cst : f32 to vector<16x16xf32>
    %7 = vector.broadcast %cst_5 : f32 to vector<16x16xf32>
    %8 = arith.select %5, %6, %7 : vector<16x16xi1>, vector<16x16xf32>
    %9 = vector.shape_cast %8 : vector<16x16xf32> to vector<1x16x16xf32>
    %c0_6 = arith.constant 0 : index
    %c0_7 = arith.constant 0 : index
    %10 = vector.load %arg1[%c0_6, %c0_7] : memref<16x128xf32, #tpu.memory_space<vmem>>, vector<16x128xf32>
    %11 = arith.truncf %10 : vector<16x128xf32> to vector<16x128xbf16>
    %c0_8 = arith.constant 0 : index
    %c0_9 = arith.constant 0 : index
    %c0_10 = arith.constant 0 : index
    %12 = vector.load %arg5[%c0_8, %c0_9, %c0_10] : memref<2x128x96xbf16, #tpu.memory_space<vmem>>, vector<1x128x96xbf16>
    %13 = vector.shape_cast %12 : vector<1x128x96xbf16> to vector<128x96xbf16>
    %cst_11 = arith.constant dense<0.000000e+00> : vector<16x96xf32>
    %14 = tpu.matmul %11, %13, %cst_11 {dimension_numbers = #tpu.dot_dimension_numbers<[1], [0], [0], [1], [0, 0, 1, 1], [], []>} : vector<16x128xbf16>, vector<128x96xbf16>, vector<16x96xf32> -> vector<16x96xf32>
    %c0_12 = arith.constant 0 : index
    %c0_13 = arith.constant 0 : index
    %c0_14 = arith.constant 0 : index
    %15 = vector.load %arg6[%c0_12, %c0_13, %c0_14] : memref<2x1x96xf32, #tpu.memory_space<vmem>>, vector<1x1x96xf32>
    %16 = vector.shape_cast %15 : vector<1x1x96xf32> to vector<1x96xf32>
    %17 = vector.broadcast %16 : vector<1x96xf32> to vector<16x96xf32>
    %18 = arith.addf %14, %17 : vector<16x96xf32>
    %19 = vector.extract_strided_slice %18 {offsets = [0, 0], sizes = [16, 16], strides = [1, 1]} : vector<16x96xf32> to vector<16x16xf32>
    %20 = vector.extract_strided_slice %18 {offsets = [0, 16], sizes = [16, 16], strides = [1, 1]} : vector<16x96xf32> to vector<16x16xf32>
    %21 = vector.shape_cast %19 : vector<16x16xf32> to vector<1x16x16xf32>
    %22 = vector.shape_cast %20 : vector<16x16xf32> to vector<1x16x16xf32>
    %23 = tpu.concatenate %21, %22 in 0 : vector<1x16x16xf32>, vector<1x16x16xf32> -> vector<2x16x16xf32>
    %24 = arith.truncf %23 : vector<2x16x16xf32> to vector<2x16x16xbf16>
    %25 = vector.extract_strided_slice %18 {offsets = [0, 32], sizes = [16, 16], strides = [1, 1]} : vector<16x96xf32> to vector<16x16xf32>
    %26 = vector.extract_strided_slice %18 {offsets = [0, 48], sizes = [16, 16], strides = [1, 1]} : vector<16x96xf32> to vector<16x16xf32>
    %27 = vector.shape_cast %25 : vector<16x16xf32> to vector<1x16x16xf32>
    %28 = vector.shape_cast %26 : vector<16x16xf32> to vector<1x16x16xf32>
    %29 = tpu.concatenate %27, %28 in 0 : vector<1x16x16xf32>, vector<1x16x16xf32> -> vector<2x16x16xf32>
    %30 = arith.truncf %29 : vector<2x16x16xf32> to vector<2x16x16xbf16>
    %31 = vector.extract_strided_slice %18 {offsets = [0, 64], sizes = [16, 16], strides = [1, 1]} : vector<16x96xf32> to vector<16x16xf32>
    %32 = vector.extract_strided_slice %18 {offsets = [0, 80], sizes = [16, 16], strides = [1, 1]} : vector<16x96xf32> to vector<16x16xf32>
    %33 = vector.shape_cast %31 : vector<16x16xf32> to vector<1x16x16xf32>
    %34 = vector.shape_cast %32 : vector<16x16xf32> to vector<1x16x16xf32>
    %35 = tpu.concatenate %33, %34 in 0 : vector<1x16x16xf32>, vector<1x16x16xf32> -> vector<2x16x16xf32>
    %36 = arith.truncf %35 : vector<2x16x16xf32> to vector<2x16x16xbf16>
    %cst_15 = arith.constant dense<0.000000e+00> : vector<2x16x16xf32>
    %37 = tpu.matmul %24, %30, %cst_15 {dimension_numbers = #tpu.dot_dimension_numbers<[2], [2], [1], [1], [0, 0, 0, 1, 1, 1], [0], [0]>} : vector<2x16x16xbf16>, vector<2x16x16xbf16>, vector<2x16x16xf32> -> vector<2x16x16xf32>
    %38 = vector.broadcast %9 : vector<1x16x16xf32> to vector<2x16x16xf32>
    %39 = arith.addf %37, %38 : vector<2x16x16xf32>
    %cst_16 = arith.constant dense<0xFF800000> : vector<2x16xf32>
    %40 = vector.multi_reduction <maximumf>, %39, %cst_16 [2] : vector<2x16x16xf32> to vector<2x16xf32>
    %41 = vector.shape_cast %40 : vector<2x16xf32> to vector<2x16x1xf32>
    %42 = vector.broadcast %41 : vector<2x16x1xf32> to vector<2x16x16xf32>
    %43 = arith.subf %39, %42 : vector<2x16x16xf32>
    %44 = math.exp %43 : vector<2x16x16xf32>
    %cst_17 = arith.constant dense<0.000000e+00> : vector<2x16xf32>
    %45 = vector.multi_reduction <add>, %44, %cst_17 [2] : vector<2x16x16xf32> to vector<2x16xf32>
    %46 = vector.shape_cast %45 : vector<2x16xf32> to vector<2x16x1xf32>
    %47 = tpu.reciprocal %46 {approx = true} : vector<2x16x1xf32> -> vector<2x16x1xf32>
    %48 = vector.broadcast %47 : vector<2x16x1xf32> to vector<2x16x16xf32>
    %49 = arith.mulf %44, %48 : vector<2x16x16xf32>
    %50 = arith.truncf %49 : vector<2x16x16xf32> to vector<2x16x16xbf16>
    %cst_18 = arith.constant dense<0.000000e+00> : vector<2x16x16xf32>
    %51 = tpu.matmul %50, %36, %cst_18 {dimension_numbers = #tpu.dot_dimension_numbers<[2], [1], [1], [2], [0, 0, 0, 1, 1, 2], [0], [0]>} : vector<2x16x16xbf16>, vector<2x16x16xbf16>, vector<2x16x16xf32> -> vector<2x16x16xf32>
    %52 = arith.truncf %51 : vector<2x16x16xf32> to vector<2x16x16xbf16>
    %c0_19 = arith.constant 0 : index
    %c0_20 = arith.constant 0 : index
    %c0_21 = arith.constant 0 : index
    %c0_22 = arith.constant 0 : index
    %53 = vector.load %arg7[%c0_19, %c0_20, %c0_21, %c0_22] : memref<2x2x16x128xbf16, #tpu.memory_space<vmem>>, vector<1x2x16x128xbf16>
    %54 = vector.shape_cast %53 : vector<1x2x16x128xbf16> to vector<2x16x128xbf16>
    %cst_23 = arith.constant dense<0.000000e+00> : vector<2x16x128xf32>
    %55 = tpu.matmul %52, %54, %cst_23 {dimension_numbers = #tpu.dot_dimension_numbers<[2], [1], [1], [2], [0, 0, 0, 1, 1, 2], [0], [0]>} : vector<2x16x16xbf16>, vector<2x16x128xbf16>, vector<2x16x128xf32> -> vector<2x16x128xf32>
    %c0_24 = arith.constant 0 : index
    %c0_25 = arith.constant 0 : index
    %c0_26 = arith.constant 0 : index
    %56 = vector.load %arg11[%c0_24, %c0_25, %c0_26] : memref<2x6x128xf32, #tpu.memory_space<vmem>>, vector<1x6x128xf32>
    %57 = vector.shape_cast %56 : vector<1x6x128xf32> to vector<6x128xf32>
    %cst_27 = arith.constant dense<0.000000e+00> : vector<16x128xf32>
    %58 = vector.multi_reduction <add>, %55, %cst_27 [0] : vector<2x16x128xf32> to vector<16x128xf32>
    %59 = vector.extract_strided_slice %57 {offsets = [0, 0], sizes = [1, 128], strides = [1, 1]} : vector<6x128xf32> to vector<1x128xf32>
    %60 = vector.broadcast %59 : vector<1x128xf32> to vector<16x128xf32>
    %61 = arith.addf %58, %60 : vector<16x128xf32>
    %62 = arith.addf %61, %10 : vector<16x128xf32>
    %63 = vector.extract_strided_slice %57 {offsets = [1, 0], sizes = [1, 128], strides = [1, 1]} : vector<6x128xf32> to vector<1x128xf32>
    %64 = vector.extract_strided_slice %57 {offsets = [2, 0], sizes = [1, 128], strides = [1, 1]} : vector<6x128xf32> to vector<1x128xf32>
    %cst_28 = arith.constant dense<0.000000e+00> : vector<16xf32>
    %65 = vector.multi_reduction <add>, %62, %cst_28 [1] : vector<16x128xf32> to vector<16xf32>
    %66 = vector.shape_cast %65 : vector<16xf32> to vector<16x1xf32>
    %67 = arith.mulf %62, %62 : vector<16x128xf32>
    %cst_29 = arith.constant dense<0.000000e+00> : vector<16xf32>
    %68 = vector.multi_reduction <add>, %67, %cst_29 [1] : vector<16x128xf32> to vector<16xf32>
    %69 = vector.shape_cast %68 : vector<16xf32> to vector<16x1xf32>
    %cst_30 = arith.constant 3.125000e-02 : f32
    %70 = vector.broadcast %cst_30 : f32 to vector<16x1xf32>
    %71 = arith.mulf %66, %70 : vector<16x1xf32>
    %cst_31 = arith.constant 3.125000e-02 : f32
    %72 = vector.broadcast %cst_31 : f32 to vector<16x1xf32>
    %73 = arith.mulf %69, %72 : vector<16x1xf32>
    %74 = arith.mulf %71, %71 : vector<16x1xf32>
    %75 = arith.subf %73, %74 : vector<16x1xf32>
    %76 = vector.broadcast %71 : vector<16x1xf32> to vector<16x128xf32>
    %77 = arith.subf %62, %76 : vector<16x128xf32>
    %cst_32 = arith.constant 9.99999974E-6 : f32
    %78 = vector.broadcast %cst_32 : f32 to vector<16x1xf32>
    %79 = arith.addf %75, %78 : vector<16x1xf32>
    %80 = math.rsqrt %79 : vector<16x1xf32>
    %81 = vector.broadcast %80 : vector<16x1xf32> to vector<16x128xf32>
    %82 = arith.mulf %77, %81 : vector<16x128xf32>
    %83 = vector.broadcast %63 : vector<1x128xf32> to vector<16x128xf32>
    %84 = arith.mulf %82, %83 : vector<16x128xf32>
    %85 = vector.broadcast %64 : vector<1x128xf32> to vector<16x128xf32>
    %86 = arith.addf %84, %85 : vector<16x128xf32>
    %87 = vector.broadcast %0 : vector<16x1xf32> to vector<16x128xf32>
    %88 = arith.mulf %86, %87 : vector<16x128xf32>
    %89 = arith.truncf %88 : vector<16x128xf32> to vector<16x128xbf16>
    %c0_33 = arith.constant 0 : index
    %c0_34 = arith.constant 0 : index
    %c0_35 = arith.constant 0 : index
    %90 = vector.load %arg8[%c0_33, %c0_34, %c0_35] : memref<2x128x128xbf16, #tpu.memory_space<vmem>>, vector<1x128x128xbf16>
    %91 = vector.shape_cast %90 : vector<1x128x128xbf16> to vector<128x128xbf16>
    %cst_36 = arith.constant dense<0.000000e+00> : vector<16x128xf32>
    %92 = tpu.matmul %89, %91, %cst_36 {dimension_numbers = #tpu.dot_dimension_numbers<[1], [0], [0], [1], [0, 0, 1, 1], [], []>} : vector<16x128xbf16>, vector<128x128xbf16>, vector<16x128xf32> -> vector<16x128xf32>
    %c0_37 = arith.constant 0 : index
    %c0_38 = arith.constant 0 : index
    %c0_39 = arith.constant 0 : index
    %93 = vector.load %arg9[%c0_37, %c0_38, %c0_39] : memref<2x1x128xf32, #tpu.memory_space<vmem>>, vector<1x1x128xf32>
    %94 = vector.shape_cast %93 : vector<1x1x128xf32> to vector<1x128xf32>
    %95 = vector.broadcast %94 : vector<1x128xf32> to vector<16x128xf32>
    %96 = arith.addf %92, %95 : vector<16x128xf32>
    %cst_40 = arith.constant 0.000000e+00 : f32
    %97 = vector.broadcast %cst_40 : f32 to vector<16x128xf32>
    %98 = arith.maximumf %96, %97 : vector<16x128xf32>
    %99 = arith.truncf %98 : vector<16x128xf32> to vector<16x128xbf16>
    %c0_41 = arith.constant 0 : index
    %c0_42 = arith.constant 0 : index
    %c0_43 = arith.constant 0 : index
    %100 = vector.load %arg10[%c0_41, %c0_42, %c0_43] : memref<2x128x128xbf16, #tpu.memory_space<vmem>>, vector<1x128x128xbf16>
    %101 = vector.shape_cast %100 : vector<1x128x128xbf16> to vector<128x128xbf16>
    %cst_44 = arith.constant dense<0.000000e+00> : vector<16x128xf32>
    %102 = tpu.matmul %99, %101, %cst_44 {dimension_numbers = #tpu.dot_dimension_numbers<[1], [0], [0], [1], [0, 0, 1, 1], [], []>} : vector<16x128xbf16>, vector<128x128xbf16>, vector<16x128xf32> -> vector<16x128xf32>
    %103 = vector.extract_strided_slice %57 {offsets = [3, 0], sizes = [1, 128], strides = [1, 1]} : vector<6x128xf32> to vector<1x128xf32>
    %104 = vector.broadcast %103 : vector<1x128xf32> to vector<16x128xf32>
    %105 = arith.addf %102, %104 : vector<16x128xf32>
    %106 = arith.addf %105, %88 : vector<16x128xf32>
    %107 = vector.extract_strided_slice %57 {offsets = [4, 0], sizes = [1, 128], strides = [1, 1]} : vector<6x128xf32> to vector<1x128xf32>
    %108 = vector.extract_strided_slice %57 {offsets = [5, 0], sizes = [1, 128], strides = [1, 1]} : vector<6x128xf32> to vector<1x128xf32>
    %cst_45 = arith.constant dense<0.000000e+00> : vector<16xf32>
    %109 = vector.multi_reduction <add>, %106, %cst_45 [1] : vector<16x128xf32> to vector<16xf32>
    %110 = vector.shape_cast %109 : vector<16xf32> to vector<16x1xf32>
    %111 = arith.mulf %106, %106 : vector<16x128xf32>
    %cst_46 = arith.constant dense<0.000000e+00> : vector<16xf32>
    %112 = vector.multi_reduction <add>, %111, %cst_46 [1] : vector<16x128xf32> to vector<16xf32>
    %113 = vector.shape_cast %112 : vector<16xf32> to vector<16x1xf32>
    %cst_47 = arith.constant 3.125000e-02 : f32
    %114 = vector.broadcast %cst_47 : f32 to vector<16x1xf32>
    %115 = arith.mulf %110, %114 : vector<16x1xf32>
    %cst_48 = arith.constant 3.125000e-02 : f32
    %116 = vector.broadcast %cst_48 : f32 to vector<16x1xf32>
    %117 = arith.mulf %113, %116 : vector<16x1xf32>
    %118 = arith.mulf %115, %115 : vector<16x1xf32>
    %119 = arith.subf %117, %118 : vector<16x1xf32>
    %120 = vector.broadcast %115 : vector<16x1xf32> to vector<16x128xf32>
    %121 = arith.subf %106, %120 : vector<16x128xf32>
    %cst_49 = arith.constant 9.99999974E-6 : f32
    %122 = vector.broadcast %cst_49 : f32 to vector<16x1xf32>
    %123 = arith.addf %119, %122 : vector<16x1xf32>
    %124 = math.rsqrt %123 : vector<16x1xf32>
    %125 = vector.broadcast %124 : vector<16x1xf32> to vector<16x128xf32>
    %126 = arith.mulf %121, %125 : vector<16x128xf32>
    %127 = vector.broadcast %107 : vector<1x128xf32> to vector<16x128xf32>
    %128 = arith.mulf %126, %127 : vector<16x128xf32>
    %129 = vector.broadcast %108 : vector<1x128xf32> to vector<16x128xf32>
    %130 = arith.addf %128, %129 : vector<16x128xf32>
    %131 = vector.broadcast %0 : vector<16x1xf32> to vector<16x128xf32>
    %132 = arith.mulf %130, %131 : vector<16x128xf32>
    %133 = arith.truncf %132 : vector<16x128xf32> to vector<16x128xbf16>
    %c1 = arith.constant 1 : index
    %c0_50 = arith.constant 0 : index
    %c0_51 = arith.constant 0 : index
    %134 = vector.load %arg5[%c1, %c0_50, %c0_51] : memref<2x128x96xbf16, #tpu.memory_space<vmem>>, vector<1x128x96xbf16>
    %135 = vector.shape_cast %134 : vector<1x128x96xbf16> to vector<128x96xbf16>
    %cst_52 = arith.constant dense<0.000000e+00> : vector<16x96xf32>
    %136 = tpu.matmul %133, %135, %cst_52 {dimension_numbers = #tpu.dot_dimension_numbers<[1], [0], [0], [1], [0, 0, 1, 1], [], []>} : vector<16x128xbf16>, vector<128x96xbf16>, vector<16x96xf32> -> vector<16x96xf32>
    %c1_53 = arith.constant 1 : index
    %c0_54 = arith.constant 0 : index
    %c0_55 = arith.constant 0 : index
    %137 = vector.load %arg6[%c1_53, %c0_54, %c0_55] : memref<2x1x96xf32, #tpu.memory_space<vmem>>, vector<1x1x96xf32>
    %138 = vector.shape_cast %137 : vector<1x1x96xf32> to vector<1x96xf32>
    %139 = vector.broadcast %138 : vector<1x96xf32> to vector<16x96xf32>
    %140 = arith.addf %136, %139 : vector<16x96xf32>
    %141 = vector.extract_strided_slice %140 {offsets = [0, 0], sizes = [16, 16], strides = [1, 1]} : vector<16x96xf32> to vector<16x16xf32>
    %142 = vector.extract_strided_slice %140 {offsets = [0, 16], sizes = [16, 16], strides = [1, 1]} : vector<16x96xf32> to vector<16x16xf32>
    %143 = vector.shape_cast %141 : vector<16x16xf32> to vector<1x16x16xf32>
    %144 = vector.shape_cast %142 : vector<16x16xf32> to vector<1x16x16xf32>
    %145 = tpu.concatenate %143, %144 in 0 : vector<1x16x16xf32>, vector<1x16x16xf32> -> vector<2x16x16xf32>
    %146 = arith.truncf %145 : vector<2x16x16xf32> to vector<2x16x16xbf16>
    %147 = vector.extract_strided_slice %140 {offsets = [0, 32], sizes = [16, 16], strides = [1, 1]} : vector<16x96xf32> to vector<16x16xf32>
    %148 = vector.extract_strided_slice %140 {offsets = [0, 48], sizes = [16, 16], strides = [1, 1]} : vector<16x96xf32> to vector<16x16xf32>
    %149 = vector.shape_cast %147 : vector<16x16xf32> to vector<1x16x16xf32>
    %150 = vector.shape_cast %148 : vector<16x16xf32> to vector<1x16x16xf32>
    %151 = tpu.concatenate %149, %150 in 0 : vector<1x16x16xf32>, vector<1x16x16xf32> -> vector<2x16x16xf32>
    %152 = arith.truncf %151 : vector<2x16x16xf32> to vector<2x16x16xbf16>
    %153 = vector.extract_strided_slice %140 {offsets = [0, 64], sizes = [16, 16], strides = [1, 1]} : vector<16x96xf32> to vector<16x16xf32>
    %154 = vector.extract_strided_slice %140 {offsets = [0, 80], sizes = [16, 16], strides = [1, 1]} : vector<16x96xf32> to vector<16x16xf32>
    %155 = vector.shape_cast %153 : vector<16x16xf32> to vector<1x16x16xf32>
    %156 = vector.shape_cast %154 : vector<16x16xf32> to vector<1x16x16xf32>
    %157 = tpu.concatenate %155, %156 in 0 : vector<1x16x16xf32>, vector<1x16x16xf32> -> vector<2x16x16xf32>
    %158 = arith.truncf %157 : vector<2x16x16xf32> to vector<2x16x16xbf16>
    %cst_56 = arith.constant dense<0.000000e+00> : vector<2x16x16xf32>
    %159 = tpu.matmul %146, %152, %cst_56 {dimension_numbers = #tpu.dot_dimension_numbers<[2], [2], [1], [1], [0, 0, 0, 1, 1, 1], [0], [0]>} : vector<2x16x16xbf16>, vector<2x16x16xbf16>, vector<2x16x16xf32> -> vector<2x16x16xf32>
    %160 = vector.broadcast %9 : vector<1x16x16xf32> to vector<2x16x16xf32>
    %161 = arith.addf %159, %160 : vector<2x16x16xf32>
    %cst_57 = arith.constant dense<0xFF800000> : vector<2x16xf32>
    %162 = vector.multi_reduction <maximumf>, %161, %cst_57 [2] : vector<2x16x16xf32> to vector<2x16xf32>
    %163 = vector.shape_cast %162 : vector<2x16xf32> to vector<2x16x1xf32>
    %164 = vector.broadcast %163 : vector<2x16x1xf32> to vector<2x16x16xf32>
    %165 = arith.subf %161, %164 : vector<2x16x16xf32>
    %166 = math.exp %165 : vector<2x16x16xf32>
    %cst_58 = arith.constant dense<0.000000e+00> : vector<2x16xf32>
    %167 = vector.multi_reduction <add>, %166, %cst_58 [2] : vector<2x16x16xf32> to vector<2x16xf32>
    %168 = vector.shape_cast %167 : vector<2x16xf32> to vector<2x16x1xf32>
    %169 = tpu.reciprocal %168 {approx = true} : vector<2x16x1xf32> -> vector<2x16x1xf32>
    %170 = vector.broadcast %169 : vector<2x16x1xf32> to vector<2x16x16xf32>
    %171 = arith.mulf %166, %170 : vector<2x16x16xf32>
    %172 = arith.truncf %171 : vector<2x16x16xf32> to vector<2x16x16xbf16>
    %cst_59 = arith.constant dense<0.000000e+00> : vector<2x16x16xf32>
    %173 = tpu.matmul %172, %158, %cst_59 {dimension_numbers = #tpu.dot_dimension_numbers<[2], [1], [1], [2], [0, 0, 0, 1, 1, 2], [0], [0]>} : vector<2x16x16xbf16>, vector<2x16x16xbf16>, vector<2x16x16xf32> -> vector<2x16x16xf32>
    %174 = arith.truncf %173 : vector<2x16x16xf32> to vector<2x16x16xbf16>
    %c1_60 = arith.constant 1 : index
    %c0_61 = arith.constant 0 : index
    %c0_62 = arith.constant 0 : index
    %c0_63 = arith.constant 0 : index
    %175 = vector.load %arg7[%c1_60, %c0_61, %c0_62, %c0_63] : memref<2x2x16x128xbf16, #tpu.memory_space<vmem>>, vector<1x2x16x128xbf16>
    %176 = vector.shape_cast %175 : vector<1x2x16x128xbf16> to vector<2x16x128xbf16>
    %cst_64 = arith.constant dense<0.000000e+00> : vector<2x16x128xf32>
    %177 = tpu.matmul %174, %176, %cst_64 {dimension_numbers = #tpu.dot_dimension_numbers<[2], [1], [1], [2], [0, 0, 0, 1, 1, 2], [0], [0]>} : vector<2x16x16xbf16>, vector<2x16x128xbf16>, vector<2x16x128xf32> -> vector<2x16x128xf32>
    %c1_65 = arith.constant 1 : index
    %c0_66 = arith.constant 0 : index
    %c0_67 = arith.constant 0 : index
    %178 = vector.load %arg11[%c1_65, %c0_66, %c0_67] : memref<2x6x128xf32, #tpu.memory_space<vmem>>, vector<1x6x128xf32>
    %179 = vector.shape_cast %178 : vector<1x6x128xf32> to vector<6x128xf32>
    %cst_68 = arith.constant dense<0.000000e+00> : vector<16x128xf32>
    %180 = vector.multi_reduction <add>, %177, %cst_68 [0] : vector<2x16x128xf32> to vector<16x128xf32>
    %181 = vector.extract_strided_slice %179 {offsets = [0, 0], sizes = [1, 128], strides = [1, 1]} : vector<6x128xf32> to vector<1x128xf32>
    %182 = vector.broadcast %181 : vector<1x128xf32> to vector<16x128xf32>
    %183 = arith.addf %180, %182 : vector<16x128xf32>
    %184 = arith.addf %183, %132 : vector<16x128xf32>
    %185 = vector.extract_strided_slice %179 {offsets = [1, 0], sizes = [1, 128], strides = [1, 1]} : vector<6x128xf32> to vector<1x128xf32>
    %186 = vector.extract_strided_slice %179 {offsets = [2, 0], sizes = [1, 128], strides = [1, 1]} : vector<6x128xf32> to vector<1x128xf32>
    %cst_69 = arith.constant dense<0.000000e+00> : vector<16xf32>
    %187 = vector.multi_reduction <add>, %184, %cst_69 [1] : vector<16x128xf32> to vector<16xf32>
    %188 = vector.shape_cast %187 : vector<16xf32> to vector<16x1xf32>
    %189 = arith.mulf %184, %184 : vector<16x128xf32>
    %cst_70 = arith.constant dense<0.000000e+00> : vector<16xf32>
    %190 = vector.multi_reduction <add>, %189, %cst_70 [1] : vector<16x128xf32> to vector<16xf32>
    %191 = vector.shape_cast %190 : vector<16xf32> to vector<16x1xf32>
    %cst_71 = arith.constant 3.125000e-02 : f32
    %192 = vector.broadcast %cst_71 : f32 to vector<16x1xf32>
    %193 = arith.mulf %188, %192 : vector<16x1xf32>
    %cst_72 = arith.constant 3.125000e-02 : f32
    %194 = vector.broadcast %cst_72 : f32 to vector<16x1xf32>
    %195 = arith.mulf %191, %194 : vector<16x1xf32>
    %196 = arith.mulf %193, %193 : vector<16x1xf32>
    %197 = arith.subf %195, %196 : vector<16x1xf32>
    %198 = vector.broadcast %193 : vector<16x1xf32> to vector<16x128xf32>
    %199 = arith.subf %184, %198 : vector<16x128xf32>
    %cst_73 = arith.constant 9.99999974E-6 : f32
    %200 = vector.broadcast %cst_73 : f32 to vector<16x1xf32>
    %201 = arith.addf %197, %200 : vector<16x1xf32>
    %202 = math.rsqrt %201 : vector<16x1xf32>
    %203 = vector.broadcast %202 : vector<16x1xf32> to vector<16x128xf32>
    %204 = arith.mulf %199, %203 : vector<16x128xf32>
    %205 = vector.broadcast %185 : vector<1x128xf32> to vector<16x128xf32>
    %206 = arith.mulf %204, %205 : vector<16x128xf32>
    %207 = vector.broadcast %186 : vector<1x128xf32> to vector<16x128xf32>
    %208 = arith.addf %206, %207 : vector<16x128xf32>
    %209 = vector.broadcast %0 : vector<16x1xf32> to vector<16x128xf32>
    %210 = arith.mulf %208, %209 : vector<16x128xf32>
    %211 = arith.truncf %210 : vector<16x128xf32> to vector<16x128xbf16>
    %c1_74 = arith.constant 1 : index
    %c0_75 = arith.constant 0 : index
    %c0_76 = arith.constant 0 : index
    %212 = vector.load %arg8[%c1_74, %c0_75, %c0_76] : memref<2x128x128xbf16, #tpu.memory_space<vmem>>, vector<1x128x128xbf16>
    %213 = vector.shape_cast %212 : vector<1x128x128xbf16> to vector<128x128xbf16>
    %cst_77 = arith.constant dense<0.000000e+00> : vector<16x128xf32>
    %214 = tpu.matmul %211, %213, %cst_77 {dimension_numbers = #tpu.dot_dimension_numbers<[1], [0], [0], [1], [0, 0, 1, 1], [], []>} : vector<16x128xbf16>, vector<128x128xbf16>, vector<16x128xf32> -> vector<16x128xf32>
    %c1_78 = arith.constant 1 : index
    %c0_79 = arith.constant 0 : index
    %c0_80 = arith.constant 0 : index
    %215 = vector.load %arg9[%c1_78, %c0_79, %c0_80] : memref<2x1x128xf32, #tpu.memory_space<vmem>>, vector<1x1x128xf32>
    %216 = vector.shape_cast %215 : vector<1x1x128xf32> to vector<1x128xf32>
    %217 = vector.broadcast %216 : vector<1x128xf32> to vector<16x128xf32>
    %218 = arith.addf %214, %217 : vector<16x128xf32>
    %cst_81 = arith.constant 0.000000e+00 : f32
    %219 = vector.broadcast %cst_81 : f32 to vector<16x128xf32>
    %220 = arith.maximumf %218, %219 : vector<16x128xf32>
    %221 = arith.truncf %220 : vector<16x128xf32> to vector<16x128xbf16>
    %c1_82 = arith.constant 1 : index
    %c0_83 = arith.constant 0 : index
    %c0_84 = arith.constant 0 : index
    %222 = vector.load %arg10[%c1_82, %c0_83, %c0_84] : memref<2x128x128xbf16, #tpu.memory_space<vmem>>, vector<1x128x128xbf16>
    %223 = vector.shape_cast %222 : vector<1x128x128xbf16> to vector<128x128xbf16>
    %cst_85 = arith.constant dense<0.000000e+00> : vector<16x128xf32>
    %224 = tpu.matmul %221, %223, %cst_85 {dimension_numbers = #tpu.dot_dimension_numbers<[1], [0], [0], [1], [0, 0, 1, 1], [], []>} : vector<16x128xbf16>, vector<128x128xbf16>, vector<16x128xf32> -> vector<16x128xf32>
    %225 = vector.extract_strided_slice %179 {offsets = [3, 0], sizes = [1, 128], strides = [1, 1]} : vector<6x128xf32> to vector<1x128xf32>
    %226 = vector.broadcast %225 : vector<1x128xf32> to vector<16x128xf32>
    %227 = arith.addf %224, %226 : vector<16x128xf32>
    %228 = arith.addf %227, %210 : vector<16x128xf32>
    %229 = vector.extract_strided_slice %179 {offsets = [4, 0], sizes = [1, 128], strides = [1, 1]} : vector<6x128xf32> to vector<1x128xf32>
    %230 = vector.extract_strided_slice %179 {offsets = [5, 0], sizes = [1, 128], strides = [1, 1]} : vector<6x128xf32> to vector<1x128xf32>
    %cst_86 = arith.constant dense<0.000000e+00> : vector<16xf32>
    %231 = vector.multi_reduction <add>, %228, %cst_86 [1] : vector<16x128xf32> to vector<16xf32>
    %232 = vector.shape_cast %231 : vector<16xf32> to vector<16x1xf32>
    %233 = arith.mulf %228, %228 : vector<16x128xf32>
    %cst_87 = arith.constant dense<0.000000e+00> : vector<16xf32>
    %234 = vector.multi_reduction <add>, %233, %cst_87 [1] : vector<16x128xf32> to vector<16xf32>
    %235 = vector.shape_cast %234 : vector<16xf32> to vector<16x1xf32>
    %cst_88 = arith.constant 3.125000e-02 : f32
    %236 = vector.broadcast %cst_88 : f32 to vector<16x1xf32>
    %237 = arith.mulf %232, %236 : vector<16x1xf32>
    %cst_89 = arith.constant 3.125000e-02 : f32
    %238 = vector.broadcast %cst_89 : f32 to vector<16x1xf32>
    %239 = arith.mulf %235, %238 : vector<16x1xf32>
    %240 = arith.mulf %237, %237 : vector<16x1xf32>
    %241 = arith.subf %239, %240 : vector<16x1xf32>
    %242 = vector.broadcast %237 : vector<16x1xf32> to vector<16x128xf32>
    %243 = arith.subf %228, %242 : vector<16x128xf32>
    %cst_90 = arith.constant 9.99999974E-6 : f32
    %244 = vector.broadcast %cst_90 : f32 to vector<16x1xf32>
    %245 = arith.addf %241, %244 : vector<16x1xf32>
    %246 = math.rsqrt %245 : vector<16x1xf32>
    %247 = vector.broadcast %246 : vector<16x1xf32> to vector<16x128xf32>
    %248 = arith.mulf %243, %247 : vector<16x128xf32>
    %249 = vector.broadcast %229 : vector<1x128xf32> to vector<16x128xf32>
    %250 = arith.mulf %248, %249 : vector<16x128xf32>
    %251 = vector.broadcast %230 : vector<1x128xf32> to vector<16x128xf32>
    %252 = arith.addf %250, %251 : vector<16x128xf32>
    %253 = vector.broadcast %0 : vector<16x1xf32> to vector<16x128xf32>
    %254 = arith.mulf %252, %253 : vector<16x128xf32>
    %c0_91 = arith.constant 0 : index
    %c0_92 = arith.constant 0 : index
    %255 = vector.load %arg12[%c0_91, %c0_92] : memref<16x128xf32, #tpu.memory_space<vmem>>, vector<16x128xf32>
    tpu.vector_store %arg12[%c0_91, %c0_92], %254 {strides = array<i32>} : memref<16x128xf32, #tpu.memory_space<vmem>>, vector<16x128xf32>,
    return
  }
  func.func @transform_0(%arg0: i32) -> (i32, i32) {
    %c0_i32 = arith.constant 0 : i32
    %c0_i32_0 = arith.constant 0 : i32
    %c0_i32_1 = arith.constant 0 : i32
    return %c0_i32, %c0_i32_0 : i32, i32
  }
  func.func @transform_1(%arg0: i32) -> (i32, i32) {
    %c0_i32 = arith.constant 0 : i32
    %c0_i32_0 = arith.constant 0 : i32
    %c0_i32_1 = arith.constant 0 : i32
    return %c0_i32, %c0_i32_0 : i32, i32
  }
  func.func @transform_2(%arg0: i32) -> (i32, i32) {
    %c0_i32 = arith.constant 0 : i32
    %c0_i32_0 = arith.constant 0 : i32
    %c0_i32_1 = arith.constant 0 : i32
    return %c0_i32, %c0_i32_0 : i32, i32
  }
  func.func @transform_3(%arg0: i32) -> (i32, i32) {
    %c0_i32 = arith.constant 0 : i32
    %c0_i32_0 = arith.constant 0 : i32
    %c0_i32_1 = arith.constant 0 : i32
    return %c0_i32, %c0_i32_0 : i32, i32
  }
  func.func @transform_4(%arg0: i32) -> (i32, i32, i32) {
    %c0_i32 = arith.constant 0 : i32
    %c0_i32_0 = arith.constant 0 : i32
    %c0_i32_1 = arith.constant 0 : i32
    %c0_i32_2 = arith.constant 0 : i32
    return %c0_i32, %c0_i32_0, %c0_i32_1 : i32, i32, i32
  }
  func.func @transform_5(%arg0: i32) -> (i32, i32, i32) {
    %c0_i32 = arith.constant 0 : i32
    %c0_i32_0 = arith.constant 0 : i32
    %c0_i32_1 = arith.constant 0 : i32
    %c0_i32_2 = arith.constant 0 : i32
    return %c0_i32, %c0_i32_0, %c0_i32_1 : i32, i32, i32
  }
  func.func @transform_6(%arg0: i32) -> (i32, i32, i32, i32) {
    %c0_i32 = arith.constant 0 : i32
    %c0_i32_0 = arith.constant 0 : i32
    %c0_i32_1 = arith.constant 0 : i32
    %c0_i32_2 = arith.constant 0 : i32
    %c0_i32_3 = arith.constant 0 : i32
    return %c0_i32, %c0_i32_0, %c0_i32_1, %c0_i32_2 : i32, i32, i32, i32
  }
  func.func @transform_7(%arg0: i32) -> (i32, i32, i32) {
    %c0_i32 = arith.constant 0 : i32
    %c0_i32_0 = arith.constant 0 : i32
    %c0_i32_1 = arith.constant 0 : i32
    %c0_i32_2 = arith.constant 0 : i32
    return %c0_i32, %c0_i32_0, %c0_i32_1 : i32, i32, i32
  }
  func.func @transform_8(%arg0: i32) -> (i32, i32, i32) {
    %c0_i32 = arith.constant 0 : i32
    %c0_i32_0 = arith.constant 0 : i32
    %c0_i32_1 = arith.constant 0 : i32
    %c0_i32_2 = arith.constant 0 : i32
    return %c0_i32, %c0_i32_0, %c0_i32_1 : i32, i32, i32
  }
  func.func @transform_9(%arg0: i32) -> (i32, i32, i32) {
    %c0_i32 = arith.constant 0 : i32
    %c0_i32_0 = arith.constant 0 : i32
    %c0_i32_1 = arith.constant 0 : i32
    %c0_i32_2 = arith.constant 0 : i32
    return %c0_i32, %c0_i32_0, %c0_i32_1 : i32, i32, i32
  }
  func.func @transform_10(%arg0: i32) -> (i32, i32, i32) {
    %c0_i32 = arith.constant 0 : i32
    %c0_i32_0 = arith.constant 0 : i32
    %c0_i32_1 = arith.constant 0 : i32
    %c0_i32_2 = arith.constant 0 : i32
    return %c0_i32, %c0_i32_0, %c0_i32_1 : i32, i32, i32
  }
  func.func @transform_11(%arg0: i32) -> (i32, i32) {
    %c0_i32 = arith.constant 0 : i32
    %c0_i32_0 = arith.constant 0 : i32
    %c0_i32_1 = arith.constant 0 : i32
    return %c0_i32, %c0_i32_0 : i32, i32
  }
}

</mosaic_0001>

<bundles_post_ra>
// kernel: tpu_custom_call.1
= control target key start
LH: loop header
LB: loop body
LE: loop exit
PB: predicated region body
PF: predicated region fallthrough
CT: control target
= control target key end

     0   :  { %16 = vsyncpa [#allocation3], 0  ;;  %s2192_s0 = inlined_call_operand.vmem [shape: f32[16,128], index: 0, kind: input, shape index: {}]   ;;  %s2193_s1 = inlined_call_operand.vmem [shape: f32[16,1], index: 1, kind: input, shape index: {}]   ;;  %s2194_s2 = inlined_call_operand.hbm [shape: f32[1,16], index: 2, kind: input, shape index: {}]   ;;  %s2195_s3 = inlined_call_operand.vmem [shape: f32[16,1], index: 3, kind: input, shape index: {}]   ;;  %s2196_s4 = inlined_call_operand.vmem [shape: bf16[2,128,96], index: 4, kind: input, shape index: {}]   ;;  %s2197_s5 = inlined_call_operand.vmem [shape: f32[2,1,96], index: 5, kind: input, shape index: {}]   ;;  %s2198_s6 = inlined_call_operand.hbm [shape: bf16[2,2,16,128], index: 6, kind: input, shape index: {}]   ;;  %s2199_s7 = inlined_call_operand.vmem [shape: bf16[2,128,128], index: 7, kind: input, shape index: {}]   ;;  %s2200_s8 = inlined_call_operand.vmem [shape: f32[2,1,128], index: 8, kind: input, shape index: {}]   ;;  %s2201_s9 = inlined_call_operand.vmem [shape: bf16[2,128,128], index: 9, kind: input, shape index: {}]   ;;  %s2202_s10 = inlined_call_operand.vmem [shape: f32[2,6,128], index: 10, kind: input, shape index: {}]   ;;  %s2203_s11 = inlined_call_operand.hbm [shape: f32[16,128], index: 11, kind: output, shape index: {}]  }
   0x1   :  { %17 = vsyncpa [#allocation6], 0 }
   0x2   :  { %18 = vsyncpa [#allocation4], 0  ;;  %s28_s19 = sshll.u32 %s2194_s2, 4  ;;  %s1792_s20 = smov [#allocation2]   ;;  %s29_s19 = int_to_ptr.hbm [resolvable:$true] %s28_s19 }
   0x3   :  { %s30_s21 = sshll.u32 %s1792_s20, 4  ;;  %s44_s24 = sshll.u32 %s2198_s6, 4  ;;  %s31_s21 = int_to_ptr.vmem [resolvable:$true] %s30_s21  ;;  %s45_s24 = int_to_ptr.hbm [resolvable:$true] %s44_s24 }
   0x4   :  { %33 = dma.hbm_to_vmem [thread:$0]  %s29_s19, 16, %s31_s21, [#allocation3]  }
   0x5   :  { %s1793_s25 = smov [#allocation5]   ;;  %s1794_s27 = smov 64  }
   0x6   :  { %s46_s26 = sshll.u32 %s1793_s25, 4  ;;  %s1795_s28 = smov 4   ;;  %s47_s26 = int_to_ptr.vmem [resolvable:$true] %s46_s26 }
   0x7   :  { %52 = dma.hbm_to_vmem [thread:$0]  %s45_s24, 512, %s47_s26, [#allocation6], %s1794_s27, %s1794_s27, %s1795_s28  }
   0x8   :  { %1786 = dma.done.wait [#allocation3], 16  }
   0x9   :  { %1787 = vsyncadd [#allocation3], 4294967280 }
   0xa   :  { %1788 = dma.done.wait [#allocation6], 512  }
   0xb   :  { %1789 = vsyncadd [#allocation6], 4294966784  ;;  %v1592_v0 = vld [vmem:[%s2196_s4 + $0x38] sm:$0xff]  ;;  %v1591_v1 = vld [vmem:[%s2196_s4 + $0x30] sm:$0xff]  ;;  %s1796_s6 = smov 112   ;;  %v1798_v23 = vmov 0  }
   0xc   :  { %163 = vmatpush.bf16.msra.mxu0 %v1592_v0  ;;  %v1590_v2 = vld [vmem:[%s2196_s4 + $0x28] sm:$0xff]  ;;  %v1589_v3 = vld [vmem:[%s2196_s4 + $0x20] sm:$0xff]  ;;  %v1588_v4 = vld [vmem:[%s2196_s4 + $0x18] sm:$0xff]  ;;  %1653 = vset.pattern.permute.xlu1 %v1798_v23  ;;  %vm196_vm0 = vcmask 130048   ;;  %v1799_v37 = vmov -1e+30  }
   0xd   :  { %v1587_v5 = vld [vmem:[%s2196_s4 + $0x10] sm:$0xff]  ;;  %v1586_v6 = vld [vmem:[%s2196_s4 + $0x8] sm:$0xff]  ;;  %v1585_v7 = vld [vmem:[%s2196_s4] sm:$0xff]  ;;  %1654 = vset.pattern.permute.xlu2 %v1798_v23  ;;  %1660 = vset.pattern.permute.xlu0 %v1798_v23  ;;  %s1300_s14 = sshll.u32 %s2203_s11, 4  ;;  %s1802_s15 = smov 8   ;;  %s1301_s14 = int_to_ptr.hbm [resolvable:$true] %s1300_s14 }
   0xe   :  { %v1898_v8 = vld [vmem:[%s2192_s0] sm:$0xff]  ;;  %v1903_v9 = vld [vmem:[%s2192_s0 + $0x8] sm:$0xff]  ;;  %s1797_s0 = smov 96  }
   0xf   :  { %v94_v10 = vpack.c.bf16 %v1903_v9, %v1898_v8  ;;  %v1661_v12 = vld [vmem:[%s2197_s5] ss:$0 sm:$0xff]  ;;  %v73_v22 = vld [vmem:[%s2193_s1 + $0x8] sm:$0xff] }
  0x10   :  { %164 = vmatpush.bf16.msra.mxu0 %v1591_v1  ;;  %82 = vperm.xlu2 %1654, %v73_v22   ;;  %v72_v34 = vld [vmem:[%s2193_s1] sm:$0xff]  ;;  %s1801_s1 = smov 128  }
  0x11   :  { %v1662_v35 = vld [vmem:[#allocation2] ss:$0 sm:$0xff] }
  0x12   :  { %v70_v60 = vld [vmem:[%s2195_s3] sm:$0xff] }
  0x14   :  { %165 = vmatpush.bf16.msra.mxu0 %v1590_v2 }
  0x18   :  { %166 = vmatpush.bf16.msra.mxu0 %v1589_v3 }
  0x1c   :  { %167 = vmatpush.bf16.msra.mxu0 %v1588_v4 }
  0x20   :  { %168 = vmatpush.bf16.msra.mxu0 %v1587_v5 }
  0x24   :  { %169 = vmatpush.bf16.msra.mxu0 %v1586_v6 }
  0x28   :  { %170 = vmatpush.bf16.msra.mxu0 %v1585_v7 }
  0x2b   :  { %171 = vmatmul.bf16.vlgmr.msra.gmra.mxu0 %v94_v10 }
  0x6a   :  { %v83_v36 = vpop.permute.xlu2 %82 }
  0x6b   :  { %vm89_vm1 = vcmp.eq.f32.partialorder %v83_v36, %v1662_v35 }
  0x6c   :  { %v1924_v38 = vsel %vm89_vm1, 0.0, %v1799_v37 }
  0xa8   :  { %v172_v11 = vpop.f32.mrf.mxu0 }
  0xa9   :  { %v173_v14 = vadd.f32 %v1661_v12, %v172_v11 }
  0xab   :  { %v185_v18 = vpack.c.bf16 %v173_v14, %v173_v14 }
  0xad   :  { %v191_v20 = vunpack.c.l.b16 %v185_v18 }
  0xb0   :  { %v174_v13 = vpop.f32.mrf.mxu0 }
  0xb1   :  { %v175_v15 = vadd.f32 %v1661_v12, %v174_v13 }
  0xb3   :  { %v186_v16 = vpack.c.bf16 %v175_v15, %v175_v15  ;;  %v1648_v17 = vpack.i.bf16 %v175_v15, %v173_v14 }
  0xb5   :  { %1649 = vrot.lane.b32.xlu0 %v1648_v17, %s1796_s6  ;;  %v192_v19 = vunpack.c.l.b16 %v186_v16 }
  0xb7   :  { %v193_v21 = vpack.c.b16 %v192_v19, %v191_v20 }
  0xbd   :  { %194 = vrot.lane.b32.xlu0 %v193_v21, %s1797_s0 }
 0x127   :  { %v1650_v24 = vpop.permute.xlu0 %1649 }
 0x128   :  { %v1652_v25 = vunpack.i.h.bf16 %v1650_v24  ;;  %v1651_v26 = vunpack.i.l.bf16 %v1650_v24 }
 0x12a   :  { %v188_v27 = vpack.c.bf16 %v1652_v25, %v1652_v25  ;;  %v187_v28 = vpack.c.bf16 %v1651_v26, %v1651_v26 }
 0x12c   :  { %v220_v29 = vunpack.c.l.b16 %v188_v27  ;;  %v219_v30 = vunpack.c.l.b16 %v187_v28 }
 0x12e   :  { %v1915_v31 = vpack.c.b16 %v220_v29, %v219_v30 }
 0x12f   :  { %v195_v32 = vpop.permute.xlu0 %194 }
 0x130   :  { %222 = vrot.lane.b32.xlu1 %v1915_v31, %s1797_s0  ;;  %v201_v33 = vsel %vm196_vm0, %v195_v32, 0 }
 0x131   :  { %210 = vmatpush.bf16.xpose.msra.mxu2 %v201_v33 }
 0x138   :  { %1346 = vmatmul.msk.bf16.vlgmr.msra.gmra.mxu2 %vm196_vm0, %v193_v21  ;;  %77 = vperm.xlu1 %1653, %v72_v34  }
 0x1a2   :  { %v223_v39 = vpop.permute.xlu1 %222 }
 0x1a3   :  { %v228_v40 = vsel %vm196_vm0, %v223_v39, 0  ;;  %v1593_v39 = vld [vmem:[#allocation5] sm:$0xff] }
 0x1a4   :  { %237 = vmatpush.bf16.xpose.msrb.mxu2 %v228_v40  ;;  %371 = vmatpush.bf16.msra.mxu1 %v1593_v39  ;;  %v1594_v40 = vld [vmem:[#allocation5 + $0x8] sm:$0xff] }
 0x1aa   :  { %v78_v41 = vpop.permute.xlu1 %77 }
 0x1ab   :  { %1347 = vmatmul.msk.bf16.vlgmr.msrb.gmra.mxu2 %vm196_vm0, %v1915_v31  ;;  %vm88_vm2 = vcmp.eq.f32.partialorder %v78_v41, %v1662_v35 }
 0x1ac   :  { %v1929_v42 = vsel %vm88_vm2, 0.0, %v1799_v37  ;;  %399 = vmatpush.bf16.msra.mxu2 %v1594_v40  ;;  %v1607_v40 = vld [vmem:[%s2201_s9 + $0x20] sm:$0xff] }
 0x1bb   :  { %v212_v43 = vpop.f32.mrf.mxu2 }
 0x1bc   :  { %v213_v44 = vadd.f32 %v212_v43, %v1929_v42 }
 0x1be   :  { %v244_v45 = vsel %vm196_vm0, %v213_v44, -inf }
 0x1bf   :  { %245 = vmax.xlane.f32.xlu1 %v244_v45 }
 0x1c3   :  { %v214_v46 = vpop.f32.mrf.mxu2 }
 0x1c4   :  { %v215_v52 = vadd.f32 %v214_v46, %v1924_v38 }
 0x1c6   :  { %v247_v57 = vsel %vm196_vm0, %v215_v52, -inf }
 0x22e   :  { %v239_v47 = vpop.f32.mrf.mxu2 }
 0x22f   :  { %v240_v48 = vadd.f32 %v239_v47, %v1929_v42 }
 0x231   :  { %v250_v49 = vsel %vm196_vm0, %v240_v48, -inf }
 0x232   :  { %251 = vmax.xlane.f32.xlu2 %v250_v49  ;;  %v246_v50 = vpop.xlane.xlu1 %245 }
 0x233   :  { %v256_v51 = vsub.f32 %v213_v44, %v246_v50 }
 0x235   :  { %v260_v53 = vmul.f32 1.442695, %v256_v51 }
 0x236   :  { %v241_v54 = vpop.f32.mrf.mxu2 }
 0x237   :  { %1666 = vpow2.f32 %v260_v53  ;;  %v242_v55 = vadd.f32 %v241_v54, %v1924_v38 }
 0x239   :  { %v253_v56 = vsel %vm196_vm0, %v242_v55, -inf }
 0x23a   :  { %254 = vmax.xlane.f32.xlu0 %v253_v56  ;;  %248 = vmax.xlane.f32.xlu2 %v247_v57  ;;  %v1956_v56 = vld [vmem:[%s2202_s10] sm:$0x3f] }
 0x23d   :  { %v1667_v58 = vpop.eup %1666 }
 0x23e   :  { %v268_v59 = vsel %vm196_vm0, %v1667_v58, 0.0 }
 0x23f   :  { %269 = vadd.xlane.f32.xlu1 %v268_v59 }
 0x258   :  { %297 = vrot.lane.b32.xlu1 %v193_v21, %s1794_s27 }
 0x260   :  { %466 = vperm.xlu1 %1653, %v70_v60  }
 0x2a5   :  { %v252_v61 = vpop.xlane.xlu2 %251 }
 0x2a6   :  { %v258_v62 = vsub.f32 %v240_v48, %v252_v61 }
 0x2a8   :  { %v264_v63 = vmul.f32 1.442695, %v258_v62 }
 0x2aa   :  { %1668 = vpow2.f32 %v264_v63 }
 0x2ad   :  { %v255_v0 = vpop.xlane.xlu0 %254  ;;  %v249_v1 = vpop.xlane.xlu2 %248 }
 0x2ae   :  { %v259_v2 = vsub.f32 %v242_v55, %v255_v0  ;;  %v257_v3 = vsub.f32 %v215_v52, %v249_v1 }
 0x2b0   :  { %v1669_v4 = vpop.eup %1668  ;;  %v266_v5 = vmul.f32 1.442695, %v259_v2  ;;  %v262_v6 = vmul.f32 1.442695, %v257_v3 }
 0x2b1   :  { %v274_v7 = vsel %vm196_vm0, %v1669_v4, 0.0 }
 0x2b2   :  { %1670 = vpow2.f32 %v266_v5  ;;  %275 = vadd.xlane.f32.xlu2 %v274_v7  ;;  %v270_v14 = vpop.xlane.xlu1 %269  ;;  %v1600_v7 = vld [vmem:[%s2199_s7 + $0x28] sm:$0xff] }
 0x2b3   :  { %1672 = vpow2.f32 %v262_v6  ;;  %v1602_v6 = vld [vmem:[%s2199_s7 + $0x38] sm:$0xff] }
 0x2b4   :  { %1674 = vrcp.f32 %v270_v14 }
 0x2b8   :  { %v1671_v10 = vpop.eup %1670 }
 0x2b9   :  { %v1673_v11 = vpop.eup %1672  ;;  %v277_v12 = vsel %vm196_vm0, %v1671_v10, 0.0 }
 0x2ba   :  { %278 = vadd.xlane.f32.xlu0 %v277_v12  ;;  %v271_v13 = vsel %vm196_vm0, %v1673_v11, 0.0  ;;  %v1675_v19 = vpop.eup %1674 }
 0x2bb   :  { %272 = vadd.xlane.f32.xlu2 %v271_v13  ;;  %v284_v20 = vmul.f32 %v1675_v19, %v1667_v58  ;;  %v409_v58 = vperm.slane %v1956_v56, 0  ;;  %v1597_v19 = vld [vmem:[%s2199_s7 + $0x10] sm:$0xff] }
 0x2bd   :  { %v288_v24 = vpack.c.bf16 %v284_v20, %v284_v20 }
 0x2bf   :  { %v294_v29 = vunpack.c.l.b16 %v288_v24  ;;  %v1595_v24 = vld [vmem:[%s2199_s7] sm:$0xff] }
 0x2ca   :  { %v298_v15 = vpop.permute.xlu1 %297 }
 0x2cb   :  { %310 = vmatpush.bf16.msrb.mxu0 %v298_v15 }
 0x2ce   :  { %322 = vrot.lane.b32.xlu0 %v1915_v31, %s1794_s27 }
 0x325   :  { %v276_v16 = vpop.xlane.xlu2 %275 }
 0x326   :  { %1676 = vrcp.f32 %v276_v16  ;;  %v1598_v16 = vld [vmem:[%s2199_s7 + $0x18] sm:$0xff] }
 0x32c   :  { %v1677_v21 = vpop.eup %1676 }
 0x32d   :  { %v279_v17 = vpop.xlane.xlu0 %278  ;;  %v286_v28 = vmul.f32 %v1677_v21, %v1669_v4  ;;  %v1596_v21 = vld [vmem:[%s2199_s7 + $0x8] sm:$0xff] }
 0x32e   :  { %1678 = vrcp.f32 %v279_v17  ;;  %v273_v18 = vpop.xlane.xlu2 %272 }
 0x32f   :  { %1680 = vrcp.f32 %v273_v18  ;;  %v290_v33 = vpack.c.bf16 %v286_v28, %v286_v28 }
 0x331   :  { %v319_v36 = vunpack.c.l.b16 %v290_v33 }
 0x334   :  { %v1679_v22 = vpop.eup %1678 }
 0x335   :  { %v1681_v23 = vpop.eup %1680  ;;  %v287_v26 = vmul.f32 %v1679_v22, %v1671_v10  ;;  %v1599_v10 = vld [vmem:[%s2199_s7 + $0x20] sm:$0xff] }
 0x336   :  { %v285_v25 = vmul.f32 %v1681_v23, %v1673_v11 }
 0x337   :  { %v291_v31 = vpack.c.bf16 %v287_v26, %v287_v26 }
 0x338   :  { %v289_v27 = vpack.c.bf16 %v285_v25, %v285_v25 }
 0x339   :  { %v320_v34 = vunpack.c.l.b16 %v291_v31  ;;  %v1610_v31 = vld [vmem:[%s2201_s9 + $0x38] sm:$0xff] }
 0x33a   :  { %v295_v30 = vunpack.c.l.b16 %v289_v27  ;;  %627 = vmatpush.bf16.msrb.mxu1 %v1610_v31 }
 0x33b   :  { %v321_v37 = vpack.c.b16 %v320_v34, %v319_v36  ;;  %v1609_v34 = vld [vmem:[%s2201_s9 + $0x30] sm:$0xff]  ;;  %v1608_v36 = vld [vmem:[%s2201_s9 + $0x28] sm:$0xff] }
 0x33c   :  { %v296_v32 = vpack.c.b16 %v295_v30, %v294_v29 }
 0x33e   :  { %1348 = vmatmul.msk.bf16.vlgmr.msrb.gmra.mxu0 %vm196_vm0, %v296_v32  ;;  %628 = vmatpush.bf16.msrb.mxu1 %v1609_v34 }
 0x340   :  { %v323_v35 = vpop.permute.xlu0 %322 }
 0x341   :  { %335 = vmatpush.bf16.msra.mxu3 %v323_v35 }
 0x342   :  { %629 = vmatpush.bf16.msrb.mxu1 %v1608_v36  ;;  %v1611_v36 = vld [vmem:[%s2196_s4 + $0x40] sm:$0xff] }
 0x344   :  { %1349 = vmatmul.msk.bf16.vlgmr.msra.gmra.mxu3 %vm196_vm0, %v321_v37 }
 0x345   :  { %545 = vmatpush.bf16.msrb.mxu3 %v1602_v6 }
 0x346   :  { %630 = vmatpush.bf16.msrb.mxu1 %v1607_v40 }
 0x3bb   :  { %v312_v41 = vpop.f32.mrf.mxu0 }
 0x3bc   :  { %v342_v43 = vpack.c.bf16 %v312_v41, %v312_v41 }
 0x3be   :  { %v352_v46 = vunpack.c.l.b16 %v342_v43 }
 0x3c3   :  { %v314_v44 = vpop.f32.mrf.mxu0 }
 0x3c4   :  { %v343_v45 = vpack.c.bf16 %v314_v44, %v314_v44 }
 0x3c6   :  { %v353_v47 = vunpack.c.l.b16 %v343_v45 }
 0x3c7   :  { %v337_v48 = vpop.f32.mrf.mxu3 }
 0x3c8   :  { %v354_v49 = vpack.c.b16 %v353_v47, %v352_v46  ;;  %v344_v50 = vpack.c.bf16 %v337_v48, %v337_v48  ;;  %v458_v48 = vperm.slane %v1956_v56, 1 }
 0x3ca   :  { %1354 = vmatmul.msk.bf16.vlgmr.msra.gmra.mxu1 %vm196_vm0, %v354_v49  ;;  %v380_v53 = vunpack.c.l.b16 %v344_v50 }
 0x3cf   :  { %v339_v51 = vpop.f32.mrf.mxu3 }
 0x3d0   :  { %v345_v52 = vpack.c.bf16 %v339_v51, %v339_v51 }
 0x3d2   :  { %v381_v54 = vunpack.c.l.b16 %v345_v52  ;;  %v461_v52 = vperm.slane %v1956_v56, 2 }
 0x3d4   :  { %v382_v55 = vpack.c.b16 %v381_v54, %v380_v53 }
 0x3d6   :  { %1359 = vmatmul.msk.bf16.vlgmr.msra.gmra.mxu2 %vm196_vm0, %v382_v55 }
 0x447   :  { %v373_v57 = vpop.f32.mrf.mxu1 }
 0x44f   :  { %v375_v0 = vpop.f32.mrf.mxu1 }
 0x459   :  { %v401_v59 = vpop.f32.mrf.mxu2 }
 0x45a   :  { %v407_v60 = vadd.f32 %v401_v59, %v373_v57 }
 0x45c   :  { %v410_v61 = vadd.f32 %v409_v58, %v407_v60  ;;  %v2014_v60 = vpop.permute.xlu1 %466 }
 0x45e   :  { %v1960_v62 = vadd.f32 %v410_v61, %v1898_v8  ;;  %v71_v8 = vld [vmem:[%s2195_s3 + $0x8] sm:$0xff] }
 0x460   :  { %414 = vadd.xlane.f32.xlu2 %v1960_v62  ;;  %v418_v63 = vmul.f32 %v1960_v62, %v1960_v62 }
 0x461   :  { %v403_v1 = vpop.f32.mrf.mxu2 }
 0x462   :  { %v408_v2 = vadd.f32 %v403_v1, %v375_v0  ;;  %420 = vadd.xlane.f32.xlu0 %v418_v63  ;;  %v1606_v1 = vld [vmem:[%s2201_s9 + $0x18] sm:$0xff] }
 0x463   :  { %631 = vmatpush.bf16.msrb.mxu1 %v1606_v1 }
 0x464   :  { %v411_v3 = vadd.f32 %v409_v58, %v408_v2  ;;  %v1605_v2 = vld [vmem:[%s2201_s9 + $0x10] sm:$0xff] }
 0x466   :  { %v1966_v4 = vadd.f32 %v411_v3, %v1903_v9  ;;  %v1601_v9 = vld [vmem:[%s2199_s7 + $0x30] sm:$0xff]  ;;  %v1604_v3 = vld [vmem:[%s2201_s9 + $0x8] sm:$0xff] }
 0x467   :  { %546 = vmatpush.bf16.msrb.mxu3 %v1601_v9  ;;  %632 = vmatpush.bf16.msrb.mxu1 %v1605_v2 }
 0x468   :  { %416 = vadd.xlane.f32.xlu2 %v1966_v4  ;;  %v419_v5 = vmul.f32 %v1966_v4, %v1966_v4 }
 0x46b   :  { %547 = vmatpush.bf16.msrb.mxu3 %v1600_v7  ;;  %633 = vmatpush.bf16.msrb.mxu1 %v1604_v3  ;;  %v690_v3 = vperm.slane %v1956_v56, 5 }
 0x46f   :  { %548 = vmatpush.bf16.msrb.mxu3 %v1599_v10 }
 0x470   :  { %422 = vadd.xlane.f32.xlu2 %v419_v5 }
 0x473   :  { %549 = vmatpush.bf16.msrb.mxu3 %v1598_v16 }
 0x477   :  { %550 = vmatpush.bf16.msrb.mxu3 %v1597_v19 }
 0x47b   :  { %551 = vmatpush.bf16.msrb.mxu3 %v1596_v21 }
 0x47f   :  { %552 = vmatpush.bf16.msrb.mxu3 %v1595_v24  ;;  %v1616_v24 = vld [vmem:[%s2196_s4 + $0x68] sm:$0xff] }
 0x488   :  { %471 = vperm.xlu2 %1654, %v71_v8   ;;  %v1663_v8 = vld [vmem:[%s2200_s8] ss:$0 sm:$0xff] }
 0x4d3   :  { %v415_v11 = vpop.xlane.xlu2 %414 }
 0x4d4   :  { %v424_v12 = vmul.f32 0.03125, %v415_v11 }
 0x4d5   :  { %v421_v13 = vpop.xlane.xlu0 %420 }
 0x4d6   :  { %v428_v14 = vmul.f32 %v424_v12, %v424_v12  ;;  %v426_v15 = vmul.f32 0.03125, %v421_v13  ;;  %v432_v45 = vsub.f32 %v1960_v62, %v424_v12  ;;  %v578_v13 = vperm.slane %v1956_v56, 3 }
 0x4d8   :  { %v430_v17 = vsub.f32 %v426_v15, %v428_v14 }
 0x4da   :  { %v434_v18 = vadd.f32 1e-05, %v430_v17 }
 0x4db   :  { %v417_v20 = vpop.xlane.xlu2 %416 }
 0x4dc   :  { %1682 = vrsqrt.f32 %v434_v18  ;;  %v425_v22 = vmul.f32 0.03125, %v417_v20  ;;  %vm442_vm4 = vweird.f32 %v434_v18 }
 0x4de   :  { %v429_v27 = vmul.f32 %v425_v22, %v425_v22  ;;  %v433_v51 = vsub.f32 %v1966_v4, %v425_v22  ;;  %v1603_v4 = vld [vmem:[%s2201_s9] sm:$0xff]  ;;  %v1618_v22 = vld [vmem:[%s2196_s4 + $0x78] sm:$0xff] }
 0x4df   :  { %634 = vmatpush.bf16.msrb.mxu1 %v1603_v4  ;;  %766 = vmatpush.bf16.msrb.mxu2 %v1618_v22 }
 0x4e2   :  { %v1683_v23 = vpop.eup %1682 }
 0x4e3   :  { %v437_v25 = vmul.f32 %v1683_v23, %v434_v18  ;;  %v423_v26 = vpop.xlane.xlu2 %422  ;;  %vm443_vm3 = vweird.f32 %v1683_v23 }
 0x4e4   :  { %v427_v28 = vmul.f32 0.03125, %v423_v26  ;;  %vm444_vm5 = vmor %vm442_vm4, %vm443_vm3  ;;  %v1614_v26 = vld [vmem:[%s2196_s4 + $0x58] sm:$0xff] }
 0x4e5   :  { %v438_v29 = vmul.f32 %v1683_v23, %v437_v25  ;;  %v1615_v25 = vld [vmem:[%s2196_s4 + $0x60] sm:$0xff] }
 0x4e6   :  { %v431_v30 = vsub.f32 %v427_v28, %v429_v27 }
 0x4e7   :  { %v439_v32 = vmul.f32 0.5, %v438_v29  ;;  %v1613_v29 = vld [vmem:[%s2196_s4 + $0x50] sm:$0xff] }
 0x4e8   :  { %v435_v33 = vadd.f32 1e-05, %v431_v30 }
 0x4e9   :  { %v440_v35 = vsub.f32 1.5, %v439_v32 }
 0x4ea   :  { %1684 = vrsqrt.f32 %v435_v33  ;;  %vm452_vm7 = vweird.f32 %v435_v33 }
 0x4eb   :  { %v441_v37 = vmul.f32 %v1683_v23, %v440_v35  ;;  %v2016_v61 = vpop.permute.xlu2 %471 }
 0x4ed   :  { %v445_v43 = vsel %vm444_vm5, %v1683_v23, %v441_v37  ;;  %v1617_v23 = vld [vmem:[%s2196_s4 + $0x70] sm:$0xff] }
 0x4ee   :  { %v456_v47 = vmul.f32 %v445_v43, %v432_v45  ;;  %767 = vmatpush.bf16.msrb.mxu2 %v1617_v23 }
 0x4f0   :  { %v1685_v39 = vpop.eup %1684  ;;  %v459_v53 = vmul.f32 %v458_v48, %v456_v47 }
 0x4f1   :  { %v447_v41 = vmul.f32 %v1685_v39, %v435_v33  ;;  %vm453_vm6 = vweird.f32 %v1685_v39  ;;  %v1612_v33 = vld [vmem:[%s2196_s4 + $0x48] sm:$0xff] }
 0x4f2   :  { %vm454_vm8 = vmor %vm452_vm7, %vm453_vm6  ;;  %v462_v58 = vadd.f32 %v461_v52, %v459_v53  ;;  %768 = vmatpush.bf16.msrb.mxu2 %v1616_v24 }
 0x4f3   :  { %v448_v44 = vmul.f32 %v1685_v39, %v447_v41 }
 0x4f4   :  { %v474_v63 = vmul.f32 %v2014_v60, %v462_v58 }
 0x4f5   :  { %v449_v46 = vmul.f32 0.5, %v448_v44 }
 0x4f6   :  { %769 = vmatpush.bf16.msrb.mxu2 %v1615_v25 }
 0x4f7   :  { %v450_v49 = vsub.f32 1.5, %v449_v46 }
 0x4f9   :  { %v451_v50 = vmul.f32 %v1685_v39, %v450_v49 }
 0x4fa   :  { %770 = vmatpush.bf16.msrb.mxu2 %v1614_v26 }
 0x4fb   :  { %v455_v54 = vsel %vm454_vm8, %v1685_v39, %v451_v50 }
 0x4fc   :  { %v457_v55 = vmul.f32 %v455_v54, %v433_v51 }
 0x4fe   :  { %v460_v57 = vmul.f32 %v458_v48, %v457_v55  ;;  %771 = vmatpush.bf16.msrb.mxu2 %v1613_v29 }
 0x500   :  { %v463_v59 = vadd.f32 %v461_v52, %v460_v57 }
 0x502   :  { %v475_v62 = vmul.f32 %v2016_v61, %v463_v59  ;;  %772 = vmatpush.bf16.msrb.mxu2 %v1612_v33 }
 0x504   :  { %v476_v0 = vpack.c.bf16 %v475_v62, %v474_v63 }
 0x506   :  { %553 = vmatmul.bf16.vlgmr.msrb.gmra.mxu3 %v476_v0  ;;  %773 = vmatpush.bf16.msrb.mxu2 %v1611_v36 }
 0x589   :  { %v554_v5 = vpop.f32.mrf.mxu3 }
 0x58a   :  { %v555_v6 = vadd.f32 %v1663_v8, %v554_v5 }
 0x58c   :  { %v559_v10 = vmax.f32 %v555_v6, 0.0 }
 0x591   :  { %v556_v9 = vpop.f32.mrf.mxu3 }
 0x592   :  { %v557_v7 = vadd.f32 %v1663_v8, %v556_v9 }
 0x594   :  { %v560_v11 = vmax.f32 %v557_v7, 0.0 }
 0x596   :  { %v561_v12 = vpack.c.bf16 %v560_v11, %v559_v10 }
 0x598   :  { %635 = vmatmul.bf16.vlgmr.msrb.gmra.mxu1 %v561_v12 }
 0x615   :  { %v636_v14 = vpop.f32.mrf.mxu1 }
 0x616   :  { %v637_v15 = vadd.f32 %v636_v14, %v578_v13 }
 0x618   :  { %v641_v16 = vadd.f32 %v637_v15, %v474_v63 }
 0x61a   :  { %643 = vadd.xlane.f32.xlu1 %v641_v16  ;;  %v647_v17 = vmul.f32 %v641_v16, %v641_v16 }
 0x61c   :  { %649 = vadd.xlane.f32.xlu0 %v647_v17 }
 0x61d   :  { %v638_v18 = vpop.f32.mrf.mxu1 }
 0x61e   :  { %v639_v19 = vadd.f32 %v638_v18, %v578_v13 }
 0x620   :  { %v2036_v20 = vadd.f32 %v639_v19, %v475_v62  ;;  %v687_v62 = vperm.slane %v1956_v56, 4  ;;  %v1664_v56 = vld [vmem:[%s2197_s5 + $0x1] ss:$0 sm:$0xff] }
 0x622   :  { %645 = vadd.xlane.f32.xlu2 %v2036_v20  ;;  %v648_v21 = vmul.f32 %v2036_v20, %v2036_v20 }
 0x624   :  { %651 = vadd.xlane.f32.xlu0 %v648_v21 }
 0x68d   :  { %v644_v27 = vpop.xlane.xlu1 %643 }
 0x68e   :  { %v653_v28 = vmul.f32 0.03125, %v644_v27 }
 0x68f   :  { %v650_v30 = vpop.xlane.xlu0 %649 }
 0x690   :  { %v657_v31 = vmul.f32 %v653_v28, %v653_v28  ;;  %v655_v32 = vmul.f32 0.03125, %v650_v30  ;;  %v661_v57 = vsub.f32 %v641_v16, %v653_v28 }
 0x692   :  { %v659_v34 = vsub.f32 %v655_v32, %v657_v31 }
 0x694   :  { %v663_v35 = vadd.f32 1e-05, %v659_v34 }
 0x695   :  { %v646_v37 = vpop.xlane.xlu2 %645 }
 0x696   :  { %1686 = vrsqrt.f32 %v663_v35  ;;  %v654_v39 = vmul.f32 0.03125, %v646_v37  ;;  %vm671_vm10 = vweird.f32 %v663_v35 }
 0x697   :  { %v652_v40 = vpop.xlane.xlu0 %651 }
 0x698   :  { %v658_v41 = vmul.f32 %v654_v39, %v654_v39  ;;  %v656_v43 = vmul.f32 0.03125, %v652_v40  ;;  %v662_v1 = vsub.f32 %v2036_v20, %v654_v39 }
 0x69a   :  { %v660_v44 = vsub.f32 %v656_v43, %v658_v41 }
 0x69c   :  { %v1687_v45 = vpop.eup %1686  ;;  %v664_v46 = vadd.f32 1e-05, %v660_v44 }
 0x69d   :  { %v666_v47 = vmul.f32 %v1687_v45, %v663_v35  ;;  %vm672_vm9 = vweird.f32 %v1687_v45 }
 0x69e   :  { %1688 = vrsqrt.f32 %v664_v46  ;;  %vm673_vm11 = vmor %vm671_vm10, %vm672_vm9  ;;  %vm681_vm13 = vweird.f32 %v664_v46 }
 0x69f   :  { %v667_v48 = vmul.f32 %v1687_v45, %v666_v47 }
 0x6a1   :  { %v668_v49 = vmul.f32 0.5, %v667_v48 }
 0x6a3   :  { %v669_v50 = vsub.f32 1.5, %v668_v49 }
 0x6a4   :  { %v1689_v51 = vpop.eup %1688 }
 0x6a5   :  { %v670_v52 = vmul.f32 %v1687_v45, %v669_v50  ;;  %v676_v53 = vmul.f32 %v1689_v51, %v664_v46  ;;  %vm682_vm12 = vweird.f32 %v1689_v51 }
 0x6a6   :  { %vm683_vm14 = vmor %vm681_vm13, %vm682_vm12 }
 0x6a7   :  { %v674_v54 = vsel %vm673_vm11, %v1687_v45, %v670_v52  ;;  %v677_v55 = vmul.f32 %v1689_v51, %v676_v53 }
 0x6a8   :  { %v685_v59 = vmul.f32 %v674_v54, %v661_v57 }
 0x6a9   :  { %v678_v58 = vmul.f32 0.5, %v677_v55 }
 0x6aa   :  { %v688_v2 = vmul.f32 %v687_v62, %v685_v59 }
 0x6ab   :  { %v679_v63 = vsub.f32 1.5, %v678_v58 }
 0x6ac   :  { %v691_v6 = vadd.f32 %v690_v3, %v688_v2 }
 0x6ad   :  { %v680_v0 = vmul.f32 %v1689_v51, %v679_v63 }
 0x6ae   :  { %v2069_v7 = vmul.f32 %v691_v6, %v2014_v60 }
 0x6af   :  { %v684_v4 = vsel %vm683_vm14, %v1689_v51, %v680_v0 }
 0x6b0   :  { %v686_v5 = vmul.f32 %v684_v4, %v662_v1 }
 0x6b2   :  { %v689_v8 = vmul.f32 %v687_v62, %v686_v5 }
 0x6b4   :  { %v692_v9 = vadd.f32 %v690_v3, %v689_v8 }
 0x6b6   :  { %v2072_v10 = vmul.f32 %v692_v9, %v2016_v61 }
 0x6b8   :  { %v695_v11 = vpack.c.bf16 %v2072_v10, %v2069_v7 }
 0x6ba   :  { %774 = vmatmul.bf16.vlgmr.msrb.gmra.mxu2 %v695_v11 }
 0x73d   :  { %v775_v12 = vpop.f32.mrf.mxu2 }
 0x73e   :  { %v776_v13 = vadd.f32 %v1664_v56, %v775_v12 }
 0x740   :  { %v788_v15 = vpack.c.bf16 %v776_v13, %v776_v13 }
 0x742   :  { %v794_v19 = vunpack.c.l.b16 %v788_v15 }
 0x745   :  { %v777_v14 = vpop.f32.mrf.mxu2 }
 0x746   :  { %v778_v16 = vadd.f32 %v1664_v56, %v777_v14 }
 0x748   :  { %v789_v17 = vpack.c.bf16 %v778_v16, %v778_v16  ;;  %v1655_v18 = vpack.i.bf16 %v778_v16, %v776_v13 }
 0x74a   :  { %v795_v20 = vunpack.c.l.b16 %v789_v17  ;;  %1656 = vrot.lane.b32.xlu1 %v1655_v18, %s1796_s6 }
 0x74c   :  { %v2080_v21 = vpack.c.b16 %v795_v20, %v794_v19 }
 0x74e   :  { %797 = vrot.lane.b32.xlu0 %v2080_v21, %s1797_s0 }
 0x7bc   :  { %v1657_v22 = vpop.permute.xlu1 %1656 }
 0x7bd   :  { %v1659_v23 = vunpack.i.h.bf16 %v1657_v22  ;;  %v1658_v24 = vunpack.i.l.bf16 %v1657_v22 }
 0x7bf   :  { %v791_v25 = vpack.c.bf16 %v1659_v23, %v1659_v23  ;;  %v790_v26 = vpack.c.bf16 %v1658_v24, %v1658_v24 }
 0x7c0   :  { %v798_v27 = vpop.permute.xlu0 %797 }
 0x7c1   :  { %v822_v28 = vunpack.c.l.b16 %v791_v25  ;;  %v821_v29 = vunpack.c.l.b16 %v790_v26  ;;  %v803_v30 = vsel %vm196_vm0, %v798_v27, 0 }
 0x7c2   :  { %812 = vmatpush.bf16.xpose.msra.mxu0 %v803_v30  ;;  %v1620_v30 = vld [vmem:[#allocation5 + $0x18] sm:$0xff] }
 0x7c3   :  { %v823_v31 = vpack.c.b16 %v822_v28, %v821_v29 }
 0x7c5   :  { %824 = vrot.lane.b32.xlu2 %v823_v31, %s1797_s0 }
 0x7c9   :  { %1473 = vmatmul.msk.bf16.vlgmr.msra.gmra.mxu0 %vm196_vm0, %v2080_v21 }
 0x81f   :  { %v825_v32 = vpop.permute.xlu2 %824 }
 0x820   :  { %v830_v33 = vsel %vm196_vm0, %v825_v32, 0 }
 0x821   :  { %839 = vmatpush.bf16.xpose.msrb.mxu0 %v830_v33 }
 0x828   :  { %1474 = vmatmul.msk.bf16.vlgmr.msrb.gmra.mxu0 %vm196_vm0, %v823_v31 }
 0x829   :  { %1002 = vmatpush.bf16.msra.mxu0 %v1620_v30 }
 0x846   :  { %v814_v34 = vpop.f32.mrf.mxu0 }
 0x847   :  { %v815_v35 = vadd.f32 %v814_v34, %v1929_v42 }
 0x849   :  { %v846_v36 = vsel %vm196_vm0, %v815_v35, -inf }
 0x84a   :  { %847 = vmax.xlane.f32.xlu0 %v846_v36 }
 0x84e   :  { %v816_v37 = vpop.f32.mrf.mxu0 }
 0x84f   :  { %v817_v39 = vadd.f32 %v816_v37, %v1924_v38 }
 0x851   :  { %v849_v40 = vsel %vm196_vm0, %v817_v39, -inf }
 0x852   :  { %850 = vmax.xlane.f32.xlu1 %v849_v40 }
 0x8a5   :  { %v841_v41 = vpop.f32.mrf.mxu0 }
 0x8a6   :  { %v842_v43 = vadd.f32 %v841_v41, %v1929_v42 }
 0x8a8   :  { %v852_v44 = vsel %vm196_vm0, %v842_v43, -inf }
 0x8a9   :  { %853 = vmax.xlane.f32.xlu2 %v852_v44 }
 0x8ad   :  { %v843_v45 = vpop.f32.mrf.mxu0 }
 0x8ae   :  { %v844_v46 = vadd.f32 %v843_v45, %v1924_v38 }
 0x8b0   :  { %v855_v47 = vsel %vm196_vm0, %v844_v46, -inf }
 0x8b1   :  { %856 = vmax.xlane.f32.xlu0 %v855_v47 }
 0x8bd   :  { %v848_v48 = vpop.xlane.xlu0 %847 }
 0x8be   :  { %v858_v49 = vsub.f32 %v815_v35, %v848_v48  ;;  %v2112_v48 = vld [vmem:[%s2202_s10 + $0x8] sm:$0x3f] }
 0x8c0   :  { %v862_v50 = vmul.f32 1.442695, %v858_v49 }
 0x8c1   :  { %924 = vrot.lane.b32.xlu2 %v823_v31, %s1794_s27  ;;  %v1619_v31 = vld [vmem:[#allocation5 + $0x10] sm:$0xff] }
 0x8c2   :  { %1690 = vpow2.f32 %v862_v50  ;;  %974 = vmatpush.bf16.msra.mxu2 %v1619_v31  ;;  %v1013_v50 = vperm.slane %v2112_v48, 0 }
 0x8c5   :  { %v851_v51 = vpop.xlane.xlu1 %850 }
 0x8c6   :  { %v859_v52 = vsub.f32 %v817_v39, %v851_v51 }
 0x8c8   :  { %v1691_v53 = vpop.eup %1690  ;;  %v864_v54 = vmul.f32 1.442695, %v859_v52 }
 0x8c9   :  { %v870_v42 = vsel %vm196_vm0, %v1691_v53, 0.0 }
 0x8ca   :  { %1692 = vpow2.f32 %v864_v54  ;;  %871 = vadd.xlane.f32.xlu1 %v870_v42 }
 0x8d0   :  { %v1693_v55 = vpop.eup %1692 }
 0x8d1   :  { %v873_v38 = vsel %vm196_vm0, %v1693_v55, 0.0 }
 0x8d2   :  { %874 = vadd.xlane.f32.xlu0 %v873_v38 }
 0x91c   :  { %v854_v57 = vpop.xlane.xlu2 %853 }
 0x91d   :  { %v860_v58 = vsub.f32 %v842_v43, %v854_v57 }
 0x91f   :  { %v866_v59 = vmul.f32 1.442695, %v860_v58 }
 0x921   :  { %1694 = vpow2.f32 %v866_v59 }
 0x924   :  { %v925_v62 = vpop.permute.xlu2 %924  ;;  %v857_v63 = vpop.xlane.xlu0 %856 }
 0x925   :  { %v861_v0 = vsub.f32 %v844_v46, %v857_v63  ;;  %937 = vmatpush.bf16.msra.mxu1 %v925_v62  ;;  %v1626_v63 = vld [vmem:[%s2199_s7 + $0x68] sm:$0xff] }
 0x927   :  { %v1695_v1 = vpop.eup %1694  ;;  %v868_v2 = vmul.f32 1.442695, %v861_v0  ;;  %v1625_v0 = vld [vmem:[%s2199_s7 + $0x60] sm:$0xff] }
 0x928   :  { %v876_v3 = vsel %vm196_vm0, %v1695_v1, 0.0 }
 0x929   :  { %1696 = vpow2.f32 %v868_v2  ;;  %877 = vadd.xlane.f32.xlu1 %v876_v3  ;;  %v1624_v2 = vld [vmem:[%s2199_s7 + $0x58] sm:$0xff]  ;;  %v1623_v3 = vld [vmem:[%s2199_s7 + $0x50] sm:$0xff] }
 0x92f   :  { %v1697_v4 = vpop.eup %1696 }
 0x930   :  { %v879_v5 = vsel %vm196_vm0, %v1697_v4, 0.0 }
 0x931   :  { %880 = vadd.xlane.f32.xlu0 %v879_v5 }
 0x93d   :  { %v872_v8 = vpop.xlane.xlu1 %871 }
 0x942   :  { %899 = vrot.lane.b32.xlu1 %v2080_v21, %s1794_s27 }
 0x945   :  { %v875_v6 = vpop.xlane.xlu0 %874 }
 0x99c   :  { %v878_v9 = vpop.xlane.xlu1 %877 }
 0x99d   :  { %1698 = vrcp.f32 %v878_v9 }
 0x99e   :  { %1700 = vrcp.f32 %v875_v6 }
 0x99f   :  { %1702 = vrcp.f32 %v872_v8  ;;  %v1622_v8 = vld [vmem:[%s2199_s7 + $0x48] sm:$0xff] }
 0x9a3   :  { %v1699_v12 = vpop.eup %1698 }
 0x9a4   :  { %v881_v11 = vpop.xlane.xlu0 %880  ;;  %v1701_v56 = vpop.eup %1700  ;;  %v888_v13 = vmul.f32 %v1699_v12, %v1695_v1 }
 0x9a5   :  { %1704 = vrcp.f32 %v881_v11  ;;  %v1703_v14 = vpop.eup %1702  ;;  %v887_v15 = vmul.f32 %v1701_v56, %v1693_v55 }
 0x9a6   :  { %v886_v17 = vmul.f32 %v1703_v14, %v1691_v53  ;;  %v892_v18 = vpack.c.bf16 %v888_v13, %v888_v13  ;;  %v1621_v13 = vld [vmem:[%s2199_s7 + $0x40] sm:$0xff] }
 0x9a7   :  { %v891_v20 = vpack.c.bf16 %v887_v15, %v887_v15 }
 0x9a8   :  { %v890_v21 = vpack.c.bf16 %v886_v17, %v886_v17  ;;  %v921_v23 = vunpack.c.l.b16 %v892_v18 }
 0x9a9   :  { %v897_v25 = vunpack.c.l.b16 %v891_v20 }
 0x9aa   :  { %v896_v27 = vunpack.c.l.b16 %v890_v21 }
 0x9ab   :  { %v1705_v16 = vpop.eup %1704 }
 0x9ac   :  { %v889_v19 = vmul.f32 %v1705_v16, %v1697_v4  ;;  %v898_v29 = vpack.c.b16 %v897_v25, %v896_v27 }
 0x9ae   :  { %v893_v22 = vpack.c.bf16 %v889_v19, %v889_v19  ;;  %v1636_v19 = vld [vmem:[%s2201_s9 + $0x78] sm:$0xff] }
 0x9af   :  { %1224 = vmatpush.bf16.msrb.mxu1 %v1636_v19 }
 0x9b0   :  { %v922_v24 = vunpack.c.l.b16 %v893_v22  ;;  %v1635_v22 = vld [vmem:[%s2201_s9 + $0x70] sm:$0xff] }
 0x9b2   :  { %v923_v26 = vpack.c.b16 %v922_v24, %v921_v23  ;;  %v1634_v24 = vld [vmem:[%s2201_s9 + $0x68] sm:$0xff] }
 0x9b3   :  { %1225 = vmatpush.bf16.msrb.mxu1 %v1635_v22 }
 0x9b4   :  { %v900_v28 = vpop.permute.xlu1 %899  ;;  %1476 = vmatmul.msk.bf16.vlgmr.msra.gmra.mxu1 %vm196_vm0, %v923_v26 }
 0x9b5   :  { %912 = vmatpush.bf16.msra.mxu3 %v900_v28  ;;  %v1633_v28 = vld [vmem:[%s2201_s9 + $0x60] sm:$0xff] }
 0x9b7   :  { %1226 = vmatpush.bf16.msrb.mxu1 %v1634_v24 }
 0x9b8   :  { %1475 = vmatmul.msk.bf16.vlgmr.msra.gmra.mxu3 %vm196_vm0, %v898_v29 }
 0x9bb   :  { %1227 = vmatpush.bf16.msrb.mxu1 %v1633_v28 }
 0xa31   :  { %v939_v32 = vpop.f32.mrf.mxu1 }
 0xa32   :  { %v946_v33 = vpack.c.bf16 %v939_v32, %v939_v32 }
 0xa34   :  { %v983_v37 = vunpack.c.l.b16 %v946_v33 }
 0xa39   :  { %v941_v34 = vpop.f32.mrf.mxu1 }
 0xa3a   :  { %v947_v35 = vpack.c.bf16 %v941_v34, %v941_v34 }
 0xa3b   :  { %v914_v36 = vpop.f32.mrf.mxu3 }
 0xa3c   :  { %v984_v39 = vunpack.c.l.b16 %v947_v35  ;;  %v944_v41 = vpack.c.bf16 %v914_v36, %v914_v36  ;;  %v1062_v36 = vperm.slane %v2112_v48, 1 }
 0xa3e   :  { %v985_v40 = vpack.c.b16 %v984_v39, %v983_v37  ;;  %v955_v45 = vunpack.c.l.b16 %v944_v41 }
 0xa40   :  { %1486 = vmatmul.msk.bf16.vlgmr.msra.gmra.mxu0 %vm196_vm0, %v985_v40 }
 0xa43   :  { %v916_v43 = vpop.f32.mrf.mxu3 }
 0xa44   :  { %v945_v44 = vpack.c.bf16 %v916_v43, %v916_v43 }
 0xa46   :  { %v956_v46 = vunpack.c.l.b16 %v945_v44  ;;  %v1065_v44 = vperm.slane %v2112_v48, 2 }
 0xa48   :  { %v957_v47 = vpack.c.b16 %v956_v46, %v955_v45 }
 0xa4a   :  { %1481 = vmatmul.msk.bf16.vlgmr.msra.gmra.mxu2 %vm196_vm0, %v957_v47 }
 0xabd   :  { %v1004_v49 = vpop.f32.mrf.mxu0 }
 0xac5   :  { %v1006_v42 = vpop.f32.mrf.mxu0 }
 0xacd   :  { %v976_v51 = vpop.f32.mrf.mxu2 }
 0xace   :  { %v1011_v52 = vadd.f32 %v1004_v49, %v976_v51 }
 0xad0   :  { %v1014_v53 = vadd.f32 %v1013_v50, %v1011_v52 }
 0xad2   :  { %v2116_v54 = vadd.f32 %v1014_v53, %v2069_v7  ;;  %v1628_v7 = vld [vmem:[%s2199_s7 + $0x78] sm:$0xff] }
 0xad3   :  { %1141 = vmatpush.bf16.msrb.mxu3 %v1628_v7 }
 0xad4   :  { %1018 = vadd.xlane.f32.xlu0 %v2116_v54  ;;  %v1022_v62 = vmul.f32 %v2116_v54, %v2116_v54 }
 0xad5   :  { %v978_v55 = vpop.f32.mrf.mxu2 }
 0xad6   :  { %v1012_v38 = vadd.f32 %v1006_v42, %v978_v55  ;;  %v1632_v42 = vld [vmem:[%s2201_s9 + $0x58] sm:$0xff]  ;;  %v1630_v55 = vld [vmem:[%s2201_s9 + $0x48] sm:$0xff] }
 0xad7   :  { %1228 = vmatpush.bf16.msrb.mxu1 %v1632_v42 }
 0xad8   :  { %v1015_v57 = vadd.f32 %v1013_v50, %v1012_v38  ;;  %v1629_v38 = vld [vmem:[%s2201_s9 + $0x40] sm:$0xff] }
 0xada   :  { %v2120_v58 = vadd.f32 %v1015_v57, %v2072_v10  ;;  %v1627_v10 = vld [vmem:[%s2199_s7 + $0x70] sm:$0xff] }
 0xadb   :  { %1142 = vmatpush.bf16.msrb.mxu3 %v1627_v10 }
 0xadc   :  { %1020 = vadd.xlane.f32.xlu0 %v2120_v58  ;;  %v1023_v59 = vmul.f32 %v2120_v58, %v2120_v58 }
 0xade   :  { %1026 = vadd.xlane.f32.xlu1 %v1023_v59 }
 0xadf   :  { %1143 = vmatpush.bf16.msrb.mxu3 %v1626_v63 }
 0xae3   :  { %1144 = vmatpush.bf16.msrb.mxu3 %v1625_v0 }
 0xae4   :  { %1024 = vadd.xlane.f32.xlu0 %v1022_v62 }
 0xae7   :  { %1145 = vmatpush.bf16.msrb.mxu3 %v1624_v2 }
 0xaeb   :  { %1146 = vmatpush.bf16.msrb.mxu3 %v1623_v3 }
 0xaef   :  { %1147 = vmatpush.bf16.msrb.mxu3 %v1622_v8 }
 0xaf3   :  { %1148 = vmatpush.bf16.msrb.mxu3 %v1621_v13 }
 0xb47   :  { %v1019_v1 = vpop.xlane.xlu0 %1018 }
 0xb48   :  { %v1028_v12 = vmul.f32 0.03125, %v1019_v1  ;;  %v1175_v1 = vperm.slane %v2112_v48, 3 }
 0xb4a   :  { %v1032_v16 = vmul.f32 %v1028_v12, %v1028_v12  ;;  %v1036_v41 = vsub.f32 %v2116_v54, %v1028_v12  ;;  %v1631_v54 = vld [vmem:[%s2201_s9 + $0x50] sm:$0xff] }
 0xb4b   :  { %1229 = vmatpush.bf16.msrb.mxu1 %v1631_v54 }
 0xb4f   :  { %v1021_v4 = vpop.xlane.xlu0 %1020  ;;  %1230 = vmatpush.bf16.msrb.mxu1 %v1630_v55 }
 0xb50   :  { %v1029_v5 = vmul.f32 0.03125, %v1021_v4 }
 0xb51   :  { %v1027_v6 = vpop.xlane.xlu1 %1026 }
 0xb52   :  { %v1033_v9 = vmul.f32 %v1029_v5, %v1029_v5  ;;  %v1031_v11 = vmul.f32 0.03125, %v1027_v6  ;;  %v1037_v33 = vsub.f32 %v2120_v58, %v1029_v5  ;;  %v1665_v58 = vld [vmem:[%s2200_s8 + $0x1] ss:$0 sm:$0xff]  ;;  %s1800_s8 = smov [#allocation7]  }
 0xb53   :  { %1231 = vmatpush.bf16.msrb.mxu1 %v1629_v38  ;;  %s1298_s9 = sshll.u32 %s1800_s8, 4  ;;  %s1299_s9 = int_to_ptr.vmem [resolvable:$true] %s1298_s9 }
 0xb54   :  { %v1035_v56 = vsub.f32 %v1031_v11, %v1033_v9 }
 0xb56   :  { %v1039_v14 = vadd.f32 1e-05, %v1035_v56 }
 0xb57   :  { %v1025_v15 = vpop.xlane.xlu0 %1024 }
 0xb58   :  { %1706 = vrsqrt.f32 %v1039_v14  ;;  %v1030_v17 = vmul.f32 0.03125, %v1025_v15  ;;  %vm1056_vm0 = vweird.f32 %v1039_v14 }
 0xb5a   :  { %v1034_v18 = vsub.f32 %v1030_v17, %v1032_v16 }
 0xb5c   :  { %v1038_v20 = vadd.f32 1e-05, %v1034_v18 }
 0xb5e   :  { %v1707_v21 = vpop.eup %1706  ;;  %1708 = vrsqrt.f32 %v1038_v20  ;;  %vm1046_vm3 = vweird.f32 %v1038_v20 }
 0xb5f   :  { %v1051_v23 = vmul.f32 %v1707_v21, %v1039_v14  ;;  %vm1057_vm15 = vweird.f32 %v1707_v21 }
 0xb60   :  { %vm1058_vm1 = vmor %vm1056_vm0, %vm1057_vm15 }
 0xb61   :  { %v1052_v25 = vmul.f32 %v1707_v21, %v1051_v23 }
 0xb63   :  { %v1053_v26 = vmul.f32 0.5, %v1052_v25 }
 0xb64   :  { %v1709_v27 = vpop.eup %1708 }
 0xb65   :  { %v1054_v29 = vsub.f32 1.5, %v1053_v26  ;;  %v1041_v30 = vmul.f32 %v1709_v27, %v1038_v20  ;;  %vm1047_vm2 = vweird.f32 %v1709_v27 }
 0xb66   :  { %vm1048_vm4 = vmor %vm1046_vm3, %vm1047_vm2 }
 0xb67   :  { %v1055_v31 = vmul.f32 %v1707_v21, %v1054_v29  ;;  %v1042_v32 = vmul.f32 %v1709_v27, %v1041_v30 }
 0xb69   :  { %v1059_v34 = vsel %vm1058_vm1, %v1707_v21, %v1055_v31  ;;  %v1043_v35 = vmul.f32 0.5, %v1042_v32  ;;  %v1284_v32 = vperm.slane %v2112_v48, 4 }
 0xb6a   :  { %v1061_v37 = vmul.f32 %v1059_v34, %v1037_v33 }
 0xb6b   :  { %v1044_v39 = vsub.f32 1.5, %v1043_v35  ;;  %v1287_v35 = vperm.slane %v2112_v48, 5 }
 0xb6c   :  { %v1064_v43 = vmul.f32 %v1062_v36, %v1061_v37 }
 0xb6d   :  { %v1045_v40 = vmul.f32 %v1709_v27, %v1044_v39 }
 0xb6e   :  { %v1067_v49 = vadd.f32 %v1065_v44, %v1064_v43 }
 0xb6f   :  { %v1049_v45 = vsel %vm1048_vm4, %v1709_v27, %v1045_v40 }
 0xb70   :  { %v1060_v46 = vmul.f32 %v1049_v45, %v1036_v41  ;;  %v1069_v52 = vmul.f32 %v1067_v49, %v2016_v61 }
 0xb72   :  { %v1063_v47 = vmul.f32 %v1062_v36, %v1060_v46 }
 0xb74   :  { %v1066_v50 = vadd.f32 %v1065_v44, %v1063_v47 }
 0xb76   :  { %v1068_v51 = vmul.f32 %v1066_v50, %v2014_v60 }
 0xb78   :  { %v1070_v53 = vpack.c.bf16 %v1069_v52, %v1068_v51 }
 0xb7a   :  { %1149 = vmatmul.bf16.vlgmr.msrb.gmra.mxu3 %v1070_v53 }
 0xbfd   :  { %v1150_v57 = vpop.f32.mrf.mxu3 }
 0xbfe   :  { %v1151_v59 = vadd.f32 %v1665_v58, %v1150_v57 }
 0xc00   :  { %v1155_v10 = vmax.f32 %v1151_v59, 0.0 }
 0xc05   :  { %v1152_v62 = vpop.f32.mrf.mxu3 }
 0xc06   :  { %v1153_v7 = vadd.f32 %v1665_v58, %v1152_v62 }
 0xc08   :  { %v1156_v63 = vmax.f32 %v1153_v7, 0.0 }
 0xc0a   :  { %v1157_v0 = vpack.c.bf16 %v1156_v63, %v1155_v10 }
 0xc0c   :  { %1232 = vmatmul.bf16.vlgmr.msrb.gmra.mxu1 %v1157_v0 }
 0xc89   :  { %v1233_v2 = vpop.f32.mrf.mxu1 }
 0xc8a   :  { %v1234_v3 = vadd.f32 %v1233_v2, %v1175_v1 }
 0xc8c   :  { %v1238_v4 = vadd.f32 %v1234_v3, %v1068_v51 }
 0xc8e   :  { %1240 = vadd.xlane.f32.xlu2 %v1238_v4  ;;  %v1244_v5 = vmul.f32 %v1238_v4, %v1238_v4 }
 0xc90   :  { %1246 = vadd.xlane.f32.xlu0 %v1244_v5 }
 0xc91   :  { %v1235_v8 = vpop.f32.mrf.mxu1 }
 0xc92   :  { %v1236_v6 = vadd.f32 %v1235_v8, %v1175_v1 }
 0xc94   :  { %v1239_v9 = vadd.f32 %v1236_v6, %v1069_v52 }
 0xc96   :  { %v1245_v11 = vmul.f32 %v1239_v9, %v1239_v9 }
 0xc98   :  { %1242 = vadd.xlane.f32.xlu0 %v1239_v9 }
 0xca0   :  { %1248 = vadd.xlane.f32.xlu0 %v1245_v11 }
 0xd01   :  { %v1241_v12 = vpop.xlane.xlu2 %1240 }
 0xd02   :  { %v1250_v56 = vmul.f32 0.03125, %v1241_v12 }
 0xd03   :  { %v1247_v13 = vpop.xlane.xlu0 %1246 }
 0xd04   :  { %v1254_v14 = vmul.f32 %v1250_v56, %v1250_v56  ;;  %v1252_v15 = vmul.f32 0.03125, %v1247_v13  ;;  %v1258_v31 = vsub.f32 %v1238_v4, %v1250_v56 }
 0xd06   :  { %v1256_v16 = vsub.f32 %v1252_v15, %v1254_v14 }
 0xd08   :  { %v1260_v17 = vadd.f32 1e-05, %v1256_v16 }
 0xd0a   :  { %1710 = vrsqrt.f32 %v1260_v17  ;;  %vm1268_vm6 = vweird.f32 %v1260_v17 }
 0xd0b   :  { %v1243_v18 = vpop.xlane.xlu0 %1242 }
 0xd0c   :  { %v1251_v20 = vmul.f32 0.03125, %v1243_v18 }
 0xd0e   :  { %v1255_v24 = vmul.f32 %v1251_v20, %v1251_v20  ;;  %v1259_v47 = vsub.f32 %v1239_v9, %v1251_v20 }
 0xd10   :  { %v1711_v19 = vpop.eup %1710 }
 0xd11   :  { %v1263_v22 = vmul.f32 %v1711_v19, %v1260_v17  ;;  %vm1269_vm5 = vweird.f32 %v1711_v19 }
 0xd12   :  { %vm1270_vm7 = vmor %vm1268_vm6, %vm1269_vm5 }
 0xd13   :  { %v1264_v21 = vmul.f32 %v1711_v19, %v1263_v22  ;;  %v1249_v23 = vpop.xlane.xlu0 %1248 }
 0xd14   :  { %v1253_v25 = vmul.f32 0.03125, %v1249_v23 }
 0xd15   :  { %v1265_v26 = vmul.f32 0.5, %v1264_v21 }
 0xd16   :  { %v1257_v27 = vsub.f32 %v1253_v25, %v1255_v24 }
 0xd17   :  { %v1266_v28 = vsub.f32 1.5, %v1265_v26 }
 0xd18   :  { %v1261_v29 = vadd.f32 1e-05, %v1257_v27 }
 0xd19   :  { %v1267_v30 = vmul.f32 %v1711_v19, %v1266_v28 }
 0xd1a   :  { %1712 = vrsqrt.f32 %v1261_v29  ;;  %vm1278_vm9 = vweird.f32 %v1261_v29 }
 0xd1b   :  { %v1271_v33 = vsel %vm1270_vm7, %v1711_v19, %v1267_v30 }
 0xd1c   :  { %v1282_v34 = vmul.f32 %v1271_v33, %v1258_v31 }
 0xd1e   :  { %v1285_v36 = vmul.f32 %v1284_v32, %v1282_v34 }
 0xd20   :  { %v1713_v37 = vpop.eup %1712  ;;  %v1288_v39 = vadd.f32 %v1287_v35, %v1285_v36 }
 0xd21   :  { %v1273_v40 = vmul.f32 %v1713_v37, %v1261_v29  ;;  %vm1279_vm8 = vweird.f32 %v1713_v37 }
 0xd22   :  { %v1290_v41 = vmul.f32 %v1288_v39, %v2014_v60  ;;  %vm1280_vm10 = vmor %vm1278_vm9, %vm1279_vm8 }
 0xd23   :  { %v1274_v43 = vmul.f32 %v1713_v37, %v1273_v40 }
 0xd24   :  { %1292 = vst [vmem:[#allocation7] sm:$0xff] %v1290_v41 }
 0xd25   :  { %v1275_v44 = vmul.f32 0.5, %v1274_v43 }
 0xd27   :  { %v1276_v45 = vsub.f32 1.5, %v1275_v44 }
 0xd29   :  { %v1277_v46 = vmul.f32 %v1713_v37, %v1276_v45 }
 0xd2b   :  { %v1281_v49 = vsel %vm1280_vm10, %v1713_v37, %v1277_v46 }
 0xd2c   :  { %v1283_v50 = vmul.f32 %v1281_v49, %v1259_v47 }
 0xd2e   :  { %v1286_v51 = vmul.f32 %v1284_v32, %v1283_v50 }
 0xd30   :  { %v1289_v48 = vadd.f32 %v1287_v35, %v1286_v51 }
 0xd32   :  { %v1291_v60 = vmul.f32 %v1289_v48, %v2016_v61 }
 0xd34   :  { %1293 = vst [vmem:[#allocation7 + $0x8] sm:$0xff] %v1291_v60 }
 0xd35   :  { %1306 = dma.vmem_to_hbm [thread:$0]  %s1299_s9, 256, %s1301_s14, [#allocation4], %s1801_s1, %s1801_s1, %s1802_s15  }
 0xd36   :  { %1790 = dma.done.wait [#allocation4], 256  }
 0xd37   :  { %1791 = vsyncadd [#allocation4], 4294967040 }
 0xd38   :  { %1311 = vsyncpa [#allocation3], 1 }
 0xd39   :  { %1312 = vsyncpa [#allocation6], 1 }
 0xd3a   :  { %1313 = vsyncpa [#allocation4], 1 }

</bundles_post_ra>
